<compile_context>
chip_gen: v5e
topology: v5e:2x2
jax: 0.10.0
libtpu: 0.0.40
codegen_flags: <defaults>
</compile_context>

<pallas_src>
import functools

import jax
import jax.numpy as jnp
from jax.experimental import pallas as pl
from jax.experimental.pallas import tpu as pltpu


def _round_up(x, m):
    return ((x + m - 1) // m) * m


def netd_kernel(x_ref, w1_ref, b1_ref, w3_ref, b3_ref, out_ref, h1_ref,
                *, wasserstein: bool):
    # Layer 1: (TILE_N, L) @ (L, K) on the MXU with f32 accumulation.
    x = x_ref[...]
    pre1 = jnp.dot(x, w1_ref[...], preferred_element_type=jnp.float32)
    h1 = jnp.tanh(pre1 + b1_ref[...])          # f32 math; tanh on the EUP
    h1_ref[...] = h1.astype(h1_ref.dtype)

    # Layer 2: K -> 1 matvec as VPU multiply + XLU lane reduction
    # (avoids a 1-column MXU matmul and its MRF drain latency).
    logit = jnp.sum(h1 * w3_ref[...], axis=-1, keepdims=True) + b3_ref[0]
    if wasserstein:   # tr_method == 'adversarial_wasserstein' -> raw linear out
        out_ref[...] = logit.astype(out_ref.dtype)
    else:
        out_ref[...] = jax.nn.sigmoid(logit).astype(out_ref.dtype)


def netd_forward(x, w1_t, b1, w3, b3, *, wasserstein: bool = False,
                 tile_n: int = 512, compute_dtype=None):
    """Forward pass of netD.

    x: (N, L); w1_t: (L, K) (= torch l1.weight.T); b1: (K,);
    w3: torch l3.weight, shape (1, K) (any shape with K elements works);
    b3: scalar / (1,).
    Returns (output (N, 1), h1 (N, K)) in x.dtype, matching the torch module.
    """
    N, L = x.shape
    K = w1_t.shape[1]
    out_dtype = x.dtype

    if compute_dtype is not None:              # bandwidth knob (v6e / v7x)
        x = x.astype(compute_dtype)
        w1_t = w1_t.astype(compute_dtype)

    # Batch tiling: pad N up to a multiple of TILE_N (rows are independent,
    # so padded rows are simply sliced off after the call).
    tile_n = _round_up(max(8, min(tile_n, _round_up(N, 8))), 8)
    n_pad = pl.cdiv(N, tile_n) * tile_n
    if n_pad != N:
        x = jnp.pad(x, ((0, n_pad - N), (0, 0)))
    num_tiles = n_pad // tile_n

    b1_2d = b1.reshape(1, K).astype(jnp.float32)
    w3_row = jnp.asarray(w3).reshape(1, K).astype(jnp.float32)
    b3_1d = jnp.asarray(b3).reshape(1).astype(jnp.float32)

    itm_in = jnp.dtype(x.dtype).itemsize
    itm_out = jnp.dtype(out_dtype).itemsize
    cost = pl.CostEstimate(
        flops=2 * n_pad * L * K + 3 * n_pad * K,
        transcendentals=n_pad * K + (0 if wasserstein else n_pad),
        bytes_accessed=(n_pad * L * itm_in + L * K * itm_in + 2 * K * 4 + 4
                        + n_pad * K * itm_out + n_pad * itm_out),
    )

    kernel = functools.partial(netd_kernel, wasserstein=wasserstein)
    out, h1 = pl.pallas_call(
        kernel,
        out_shape=(
            jax.ShapeDtypeStruct((n_pad, 1), out_dtype),   # sigmoid / linear out
            jax.ShapeDtypeStruct((n_pad, K), out_dtype),   # h1 (tanh activations)
        ),
        grid=(num_tiles,),
        in_specs=[
            pl.BlockSpec((tile_n, L), lambda i: (i, 0)),   # x tile
            pl.BlockSpec((L, K), lambda i: (0, 0)),        # w1 (resident)
            pl.BlockSpec((1, K), lambda i: (0, 0)),        # b1 (resident)
            pl.BlockSpec((1, K), lambda i: (0, 0)),        # w3 row (resident)
            pl.BlockSpec(memory_space=pltpu.MemorySpace.SMEM),  # b3 scalar
        ],
        out_specs=(
            pl.BlockSpec((tile_n, 1), lambda i: (i, 0)),
            pl.BlockSpec((tile_n, K), lambda i: (i, 0)),
        ),
        compiler_params=pltpu.CompilerParams(
            dimension_semantics=("parallel",)),
        cost_estimate=cost,
    )(x, w1_t, b1_2d, w3_row, b3_1d)

    if n_pad != N:
        out = out[:N]
        h1 = h1[:N]
    return out, h1


def init_linear_params(key, in_features, out_features, dtype=jnp.float32):
    # Mimic torch nn.Linear default init: U(-1/sqrt(fan_in), 1/sqrt(fan_in)).
    kw, kb = jax.random.split(key)
    bound = 1.0 / (in_features ** 0.5)
    w = jax.random.uniform(kw, (out_features, in_features), dtype,
                           minval=-bound, maxval=bound)
    b = jax.random.uniform(kb, (out_features,), dtype,
                           minval=-bound, maxval=bound)
    return w, b


def reference_forward(x, w1, b1, w3, b3, wasserstein):
    hp = jax.lax.Precision.HIGHEST
    h1 = jnp.tanh(jnp.dot(x, w1.T, precision=hp) + b1)
    logit = jnp.dot(h1, w3.T, precision=hp) + b3
    out = logit if wasserstein else jax.nn.sigmoid(logit)
    return out, h1


if __name__ == "__main__":
    key = jax.random.PRNGKey(0)
    # (N, L, K, wasserstein):
    #   config 0: K = 128 keeps the dominant h1 writeback lane-dense; N = 1000
    #             exercises the batch tiling (2 tiles of 512) and padding.
    #   config 1: small non-128 K and the wasserstein (linear) head.
    configs = [
        (1000, 128, 128, False),
        (64, 32, 32, True),
    ]
    for (N, L, K, wass) in configs:
        kx, k1, k3, key = jax.random.split(key, 4)
        x = jax.random.normal(kx, (N, L), jnp.float32)
        w1, b1 = init_linear_params(k1, L, K)   # l1: Linear(L, K)
        w3, b3 = init_linear_params(k3, K, 1)   # l3: Linear(K, 1)

        out, h1 = netd_forward(x, w1.T, b1, w3, b3, wasserstein=wass)
        jax.block_until_ready((out, h1))

        out_ref, h1_ref = reference_forward(x, w1, b1, w3, b3, wass)
        assert out.shape == (N, 1) and h1.shape == (N, K)
        assert jnp.allclose(h1, h1_ref, atol=1e-4, rtol=1e-4)
        assert jnp.allclose(out, out_ref, atol=1e-4, rtol=1e-4)

    print("KERNEL_OK")
</pallas_src>

<mosaic_0001>
module attributes {stable_mosaic.version = 11 : i64} {
  func.func @netd_kernel(%arg0: i32, %arg1: memref<512x128xf32, #tpu.memory_space<vmem>>, %arg2: memref<128x128xf32, #tpu.memory_space<vmem>>, %arg3: memref<1x128xf32, #tpu.memory_space<vmem>>, %arg4: memref<1x128xf32, #tpu.memory_space<vmem>>, %arg5: memref<1xf32, #tpu.memory_space<smem>>, %arg6: memref<512x1xf32, #tpu.memory_space<vmem>>, %arg7: memref<512x128xf32, #tpu.memory_space<vmem>>) attributes {dimension_semantics = [#tpu.dimension_semantics<parallel>], iteration_bounds = array<i64: 2>, scalar_prefetch = 0 : i64, scratch_operands = 0 : i64, tpu.core_type = #tpu.core_type<tc>, window_params = [{transform_indices = @transform_0, window_bounds = array<i64: 512, 128>}, {pipeline_mode = #tpu.pipeline_mode<synchronous>, transform_indices = @transform_1, window_bounds = array<i64: 128, 128>}, {pipeline_mode = #tpu.pipeline_mode<synchronous>, transform_indices = @transform_2, window_bounds = array<i64: 1, 128>}, {pipeline_mode = #tpu.pipeline_mode<synchronous>, transform_indices = @transform_3, window_bounds = array<i64: 1, 128>}, {transform_indices = @transform_4, window_bounds = array<i64: 1>}, {transform_indices = @transform_5, window_bounds = array<i64: 512, 1>}, {transform_indices = @transform_6, window_bounds = array<i64: 512, 128>}]} {
    %c0 = arith.constant 0 : index
    %c0_0 = arith.constant 0 : index
    %0 = vector.load %arg1[%c0, %c0_0] : memref<512x128xf32, #tpu.memory_space<vmem>>, vector<512x128xf32>
    %c0_1 = arith.constant 0 : index
    %c0_2 = arith.constant 0 : index
    %1 = vector.load %arg2[%c0_1, %c0_2] : memref<128x128xf32, #tpu.memory_space<vmem>>, vector<128x128xf32>
    %cst = arith.constant dense<0.000000e+00> : vector<512x128xf32>
    %2 = tpu.matmul %0, %1, %cst {dimension_numbers = #tpu.dot_dimension_numbers<[1], [0], [0], [1], [0, 0, 1, 1], [], []>} : vector<512x128xf32>, vector<128x128xf32>, vector<512x128xf32> -> vector<512x128xf32>
    %c0_3 = arith.constant 0 : index
    %c0_4 = arith.constant 0 : index
    %3 = vector.load %arg3[%c0_3, %c0_4] : memref<1x128xf32, #tpu.memory_space<vmem>>, vector<1x128xf32>
    %4 = vector.broadcast %3 : vector<1x128xf32> to vector<512x128xf32>
    %5 = arith.addf %2, %4 : vector<512x128xf32>
    %6 = math.tanh %5 : vector<512x128xf32>
    %c0_5 = arith.constant 0 : index
    %c0_6 = arith.constant 0 : index
    %7 = vector.load %arg7[%c0_5, %c0_6] : memref<512x128xf32, #tpu.memory_space<vmem>>, vector<512x128xf32>
    tpu.vector_store %arg7[%c0_5, %c0_6], %6 {strides = array<i32>} : memref<512x128xf32, #tpu.memory_space<vmem>>, vector<512x128xf32>,
    %c0_7 = arith.constant 0 : index
    %c0_8 = arith.constant 0 : index
    %8 = vector.load %arg4[%c0_7, %c0_8] : memref<1x128xf32, #tpu.memory_space<vmem>>, vector<1x128xf32>
    %9 = vector.broadcast %8 : vector<1x128xf32> to vector<512x128xf32>
    %10 = arith.mulf %6, %9 : vector<512x128xf32>
    %cst_9 = arith.constant dense<0.000000e+00> : vector<512xf32>
    %11 = vector.multi_reduction <add>, %10, %cst_9 [1] : vector<512x128xf32> to vector<512xf32>
    %12 = vector.shape_cast %11 : vector<512xf32> to vector<512x1xf32>
    %c0_10 = arith.constant 0 : index
    %13 = memref.load %arg5[%c0_10] : memref<1xf32, #tpu.memory_space<smem>>
    %14 = vector.broadcast %13 : f32 to vector<512x1xf32>
    %15 = arith.addf %12, %14 : vector<512x1xf32>
    %16 = arith.negf %15 : vector<512x1xf32>
    %17 = math.exp %16 : vector<512x1xf32>
    %cst_11 = arith.constant 1.000000e+00 : f32
    %18 = vector.broadcast %cst_11 : f32 to vector<512x1xf32>
    %19 = arith.addf %18, %17 : vector<512x1xf32>
    %20 = arith.divf %18, %19 : vector<512x1xf32>
    %c0_12 = arith.constant 0 : index
    %c0_13 = arith.constant 0 : index
    %21 = vector.load %arg6[%c0_12, %c0_13] : memref<512x1xf32, #tpu.memory_space<vmem>>, vector<512x1xf32>
    tpu.vector_store %arg6[%c0_12, %c0_13], %20 {strides = array<i32>} : memref<512x1xf32, #tpu.memory_space<vmem>>, vector<512x1xf32>,
    return
  }
  func.func @transform_0(%arg0: i32) -> (i32, i32) {
    %c0_i32 = arith.constant 0 : i32
    %c0_i32_0 = arith.constant 0 : i32
    return %arg0, %c0_i32 : i32, i32
  }
  func.func @transform_1(%arg0: i32) -> (i32, i32) {
    %c0_i32 = arith.constant 0 : i32
    %c0_i32_0 = arith.constant 0 : i32
    %c0_i32_1 = arith.constant 0 : i32
    return %c0_i32, %c0_i32_0 : i32, i32
  }
  func.func @transform_2(%arg0: i32) -> (i32, i32) {
    %c0_i32 = arith.constant 0 : i32
    %c0_i32_0 = arith.constant 0 : i32
    %c0_i32_1 = arith.constant 0 : i32
    return %c0_i32, %c0_i32_0 : i32, i32
  }
  func.func @transform_3(%arg0: i32) -> (i32, i32) {
    %c0_i32 = arith.constant 0 : i32
    %c0_i32_0 = arith.constant 0 : i32
    %c0_i32_1 = arith.constant 0 : i32
    return %c0_i32, %c0_i32_0 : i32, i32
  }
  func.func @transform_4(%arg0: i32) -> i32 {
    %c0_i32 = arith.constant 0 : i32
    %c0_i32_0 = arith.constant 0 : i32
    return %c0_i32 : i32
  }
  func.func @transform_5(%arg0: i32) -> (i32, i32) {
    %c0_i32 = arith.constant 0 : i32
    %c0_i32_0 = arith.constant 0 : i32
    return %arg0, %c0_i32 : i32, i32
  }
  func.func @transform_6(%arg0: i32) -> (i32, i32) {
    %c0_i32 = arith.constant 0 : i32
    %c0_i32_0 = arith.constant 0 : i32
    return %arg0, %c0_i32 : i32, i32
  }
}

</mosaic_0001>

<bundles_post_ra>
// kernel: tpu_custom_call.1
= control target key start
LH: loop header
LB: loop body
LE: loop exit
PB: predicated region body
PF: predicated region fallthrough
CT: control target
= control target key end

     0   :  { %s4922_s0 = inlined_call_operand.hbm [shape: f32[1024,128], index: 0, kind: input, shape index: {}]   ;;  %s4923_s1 = inlined_call_operand.hbm [shape: f32[128,128], index: 1, kind: input, shape index: {}]   ;;  %s4924_s2 = inlined_call_operand.vmem [shape: f32[1,128], index: 2, kind: input, shape index: {}]   ;;  %s4925_s3 = inlined_call_operand.vmem [shape: f32[1,128], index: 3, kind: input, shape index: {}]   ;;  %s4926_s4 = inlined_call_operand.<no memory space> [shape: f32[1], index: 4, kind: input, shape index: {}]   ;;  %s4927_s5 = inlined_call_operand.vmem [shape: f32[1024,1], index: 5, kind: output, shape index: {0}]   ;;  %s4928_s6 = inlined_call_operand.hbm [shape: f32[1024,128], index: 6, kind: output, shape index: {1}]  }
   0x1   :  { %12 = sst [smem:[#allocation2]] %s4926_s4 }
   0x2   :  { %13 = vsyncpa [#allocation4], 0 }
   0x3   :  { %15 = vsyncpa [#allocation4 + $0x1], 0 }
   0x4   :  { %16 = vsyncpa [#allocation7], 0 }
   0x5   :  { %17 = vsyncpa [#allocation5], 0 }
   0x6   :  { %19 = vsyncpa [#allocation5 + $0x1], 0  ;;  %s3159_s23 = smov 0   ;;  %s3161_s24 = smov 0  }
   0x7   :  { %s3163_s25 = smov 0   ;;  %s3165_s26 = smov 0  }
   0x8 LB: > { %s3180_s4 = sadd.s32 4294967295, %s3114_s26   ;;  %s2403_s27 = sadd.s32 4294967294, %s3114_s26   ;;  %s3114_s26 = sphi %s3165_s26, %s5045_s26   ;;  %s3110_s25 = sphi %s3163_s25, %s5044_s25   ;;  %s3106_s24 = sphi %s3161_s24, %s5043_s24   ;;  %s3102_s23 = sphi %s3159_s23, %s5042_s23  }
   0x9   : > { %p45_p0 = scmp.ne.s32.totalorder %s3106_s24, %s3102_s23  ;;  %p46_p1 = scmp.eq.s32.totalorder %s3180_s4, 0 }
   0xa   : > { %p179_p2 = scmp.eq.s32.totalorder %s3180_s4, 1  ;;  %p185_p3 = scmp.eq.s32.totalorder %s2403_s27, 1 }
   0xb   : > { %p3189_p4 = por %p46_p1, %p45_p0  ;;  %p2404_p5 = scmp.ge.s32.totalorder %s3114_s26, 1 }
   0xc   : > { %p3194_p6 = por %p185_p3, %p45_p0  ;;  %p192_p7 = scmp.lt.s32.totalorder %s3114_s26, 3 }
   0xd   : > { %s203_s8 = sshll.u32 %s4923_s1, 4  ;;  %s3116_s10 = smov [#allocation6]   ;;  %s204_s8 = int_to_ptr.hbm [resolvable:$true] %s203_s8 }
   0xe   : > { %p3202_p8 = pnand %p2404_p5, %p192_p7  ;;  %s205_s11 = sshll.u32 %s3116_s10, 4  ;;  %s206_s11 = int_to_ptr.vmem [resolvable:$true] %s205_s11 }
   0xf   : > { %s3212_s12 = sadd.s32 1, %s3114_s26   ;;  %s4929_s13 = smov 128  }
  0x10   : > { %p2543_p9 = pneg %p3202_p8  ;;  %s3118_s14 = smov 8  }
  0x11   : > { %s29_s15 = ssub.s32 %s3114_s26, %s3212_s12  ;;  %s32_s16 = sadd.s32 1, %s3110_s25 }
  0x12   : > { %p2544_p10 = pnand %p2543_p9, %p46_p1  ;;  %p30_p12 = scmp.eq.s32.totalorder %s29_s15, 0 }
  0x13   : > { %p39_p13 = scmp.ne.s32.totalorder %s3110_s25, %s3106_s24  ;;  %p40_p0 = scmp.eq.s32.totalorder %s3114_s26, 0 }
  0x14   : > { %2546 = dma.hbm_to_vmem [thread:$0]  (!%p2544_p10), %s204_s8, 2048, %s206_s11, [#allocation7], %s4929_s13, %s4929_s13, %s3118_s14  }
  0x15   : > { %s3224_s17 = scalar_select %p30_p12, %s3110_s25, %s32_s16  }
  0x16   : > { %p3228_p3 = por %p179_p2, %p39_p13  ;;  %p2556_p5 = scmp.lt.s32.totalorder %s3114_s26, 2 }
  0x17   : > { %s228_s19 = sand.u32 1, %s3110_s25   ;;  %s2485_s20 = sshll.u32 %s3114_s26, 9 }
  0x18   : > { %p41_p7 = por %p40_p0, %p39_p13  ;;  %s2407_s21 = sshll.u32 %s228_s19, 9 }
  0x19   : > { %s237_s30 = scalar_lea.hbm %s4922_s0, %s2485_s20  ;;  %s232_s8 = scalar_lea.vmem [#allocation3], %s2407_s21 }
  0x1a   : > { %s238_s7 = sshll.u32 %s237_s30, 4  ;;  %s240_s10 = sshll.u32 %s232_s8, 4  ;;  %s239_s7 = int_to_ptr.hbm [resolvable:$true] %s238_s7  ;;  %s241_s10 = int_to_ptr.vmem [resolvable:$true] %s240_s10 }
  0x1b   : > { %p3238_p9 = pnand %p2556_p5, %p41_p7  ;;  %s229_s15 = scalar_lea.sflag [#allocation4], %s228_s19 }
  0x1c   : > { %s3014_s16 = sshra.s32 %s239_s7, 4  ;;  %s3021_s21 = scalar_lea.hbm %s4922_s0, 1024  ;;  %s3015_s16 = int_to_ptr.hbm [resolvable:$true] %s3014_s16 }
  0x1d   : > { %s3016_s13 = scalar_lea.hbm %s3015_s16, 512  ;;  %p3018_p10 = pneg %p3238_p9 }
  0x1e   : > { %p3017_p2 = scmp.ne.s32.totalorder %s3015_s16, %s3016_s13  ;;  %p3022_p0 = scmp.lt.s32.totalorder %s3015_s16, %s4922_s0 }
  0x1f   : > { %p3023_p5 = scmp.lt.s32.totalorder %s3021_s21, %s3016_s13 }
  0x20   : > { %p3019_p12 = pnand %p3018_p10, %p3017_p2 }
  0x21   : > { %p3024_p7 = por %p3023_p5, %p3022_p0 }
  0x22   : > { %p3020_p13 = pneg %p3019_p12 }
  0x24   : > { %p3025_p11 = pnand %p3024_p7, %p3020_p13 }
  0x26   : > { %3028 = shalt.err (!%p3025_p11)
}
  0x27   : > { %s4935_s19 = smov 128   ;;  %252 = sbr.rel (%p3202_p8) target bundleno = 627 (0x273), region = 40 }
  0x28   : > { %2550 = dma.hbm_to_vmem [thread:$0]  (!%p3238_p9), %s239_s7, 8192, %s241_s10, %s229_s15, %s4935_s19, %s4935_s19, %s3118_s14  }
  0x29   : > { %s3258_s8 = sand.u32 (!%p3202_p8), 1, %s3106_s24  }
  0x2a   : > { %s2411_s13 = sshll.u32 (!%p3202_p8), %s3258_s8, 9  ;;  %s255_s16 = scalar_lea.sflag (!%p3202_p8), [#allocation4], %s3258_s8 }
  0x2b   : > { %s3264_s20 = scalar_lea.vmem (!%p3202_p8), [#allocation3], %s2411_s13 }
  0x2c   : > { %3089 = dma.done.wait (%p3189_p4), %s255_s16, 8192  }
  0x2d   : > { %3091 = vsyncadd (%p3189_p4), %s255_s16, 4294959104 }
  0x2e   : > { %3093 = dma.done.wait (%p46_p1), [#allocation7], 2048  }
  0x2f   : > { %3095 = vsyncadd (%p46_p1), [#allocation7], 4294965248  ;;  %v385_v0 = vld [vmem:[#allocation6 + $0x78] sm:$0xff]  ;;  %v384_v1 = vld [vmem:[#allocation6 + $0x70] sm:$0xff]  ;;  %s3356_s10 = scalar_lea.vmem [#allocation8], %s2411_s13  ;;  %s923_s11 = sld [smem:[#allocation2]] }
  0x30   : > { %390 = vmatpush.msra.mxu0 %v385_v0  ;;  %2487 = vmatpush.msra.mxu1 %v385_v0  ;;  %v383_v2 = vld [vmem:[#allocation6 + $0x68] sm:$0xff]  ;;  %v382_v3 = vld [vmem:[#allocation6 + $0x60] sm:$0xff]  ;;  %v381_v4 = vld [vmem:[#allocation6 + $0x58] sm:$0xff]  ;;  %s2414_s15 = sshll.u32 %s3180_s4, 6  ;;  %vm2205_vm0 = vcmask 7168   ;;  %s2486_s9 = sshll.u32 %s3180_s4, 9 }
  0x31   : > { %2488 = vmatpush.msra.mxu2 %v385_v0  ;;  %2489 = vmatpush.msra.mxu3 %v385_v0  ;;  %v380_v5 = vld [vmem:[#allocation6 + $0x50] sm:$0xff]  ;;  %v379_v6 = vld [vmem:[#allocation6 + $0x48] sm:$0xff]  ;;  %v378_v7 = vld [vmem:[#allocation6 + $0x40] sm:$0xff]  ;;  %p3655_p1 = scmp.lt.s32.totalorder %s2414_s15, 127  ;;  %s3064_s13 = scalar_lea.hbm %s4928_s6, 1024 }
  0x32   : > { %391 = vmatpush.msra.mxu0 %v384_v1  ;;  %2490 = vmatpush.msra.mxu1 %v384_v1  ;;  %v377_v8 = vld [vmem:[#allocation6 + $0x38] sm:$0xff]  ;;  %v376_v9 = vld [vmem:[#allocation6 + $0x30] sm:$0xff]  ;;  %v375_v10 = vld [vmem:[#allocation6 + $0x28] sm:$0xff] }
  0x33   : > { %2491 = vmatpush.msra.mxu2 %v384_v1  ;;  %2492 = vmatpush.msra.mxu3 %v384_v1  ;;  %v374_v11 = vld [vmem:[#allocation6 + $0x20] sm:$0xff]  ;;  %v373_v12 = vld [vmem:[#allocation6 + $0x18] sm:$0xff]  ;;  %v372_v13 = vld [vmem:[#allocation6 + $0x10] sm:$0xff]  ;;  %s5047_s15 = smov (!%p3655_p1, %s2414_s15), 127 }
  0x34   : > { %392 = vmatpush.msra.mxu0 %v383_v2  ;;  %2493 = vmatpush.msra.mxu1 %v383_v2  ;;  %v371_v14 = vld [vmem:[#allocation6 + $0x8] sm:$0xff]  ;;  %v370_v15 = vld [vmem:[#allocation6] sm:$0xff]  ;;  %v308_v24 = vld [vmem:[%s3264_s20 + $0x10] sm:$0xff]  ;;  %s2415_s21 = sshll.u32 %s5047_s15, 3  ;;  %s2292_s15 = sshll.u32 %s3356_s10, 4  ;;  %s4366_s15 = int_to_ptr.vmem [resolvable:$true] %s2292_s15 }
  0x35   : > { %2494 = vmatpush.msra.mxu2 %v383_v2  ;;  %2495 = vmatpush.msra.mxu3 %v383_v2  ;;  %v306_v16 = vld [vmem:[%s3264_s20] sm:$0xff]  ;;  %v307_v20 = vld [vmem:[%s3264_s20 + $0x8] sm:$0xff]  ;;  %v324_v25 = vld [vmem:[%s3264_s20 + $0x90] sm:$0xff]  ;;  %s3730_s19 = scalar_lea.vmem %s4927_s5, %s2415_s21 }
  0x36   : > { %393 = vmatpush.msra.mxu0 %v382_v3  ;;  %2496 = vmatpush.msra.mxu1 %v382_v3  ;;  %v322_v17 = vld [vmem:[%s3264_s20 + $0x80] sm:$0xff]  ;;  %v323_v21 = vld [vmem:[%s3264_s20 + $0x88] sm:$0xff]  ;;  %v340_v26 = vld [vmem:[%s3264_s20 + $0x110] sm:$0xff] }
  0x37   : > { %2497 = vmatpush.msra.mxu2 %v382_v3  ;;  %2498 = vmatpush.msra.mxu3 %v382_v3  ;;  %v338_v18 = vld [vmem:[%s3264_s20 + $0x100] sm:$0xff]  ;;  %v339_v22 = vld [vmem:[%s3264_s20 + $0x108] sm:$0xff]  ;;  %v356_v27 = vld [vmem:[%s3264_s20 + $0x190] sm:$0xff] }
  0x38   : > { %394 = vmatpush.msra.mxu0 %v381_v4  ;;  %2499 = vmatpush.msra.mxu1 %v381_v4  ;;  %v354_v19 = vld [vmem:[%s3264_s20 + $0x180] sm:$0xff]  ;;  %v355_v23 = vld [vmem:[%s3264_s20 + $0x188] sm:$0xff]  ;;  %v309_v28 = vld [vmem:[%s3264_s20 + $0x18] sm:$0xff] }
  0x39   : > { %2500 = vmatpush.msra.mxu2 %v381_v4  ;;  %2501 = vmatpush.msra.mxu3 %v381_v4  ;;  %v325_v29 = vld [vmem:[%s3264_s20 + $0x98] sm:$0xff]  ;;  %v310_v32 = vld [vmem:[%s3264_s20 + $0x20] sm:$0xff]  ;;  %v311_v36 = vld [vmem:[%s3264_s20 + $0x28] sm:$0xff] }
  0x3a   : > { %395 = vmatpush.msra.mxu0 %v380_v5  ;;  %2502 = vmatpush.msra.mxu1 %v380_v5  ;;  %v341_v30 = vld [vmem:[%s3264_s20 + $0x118] sm:$0xff]  ;;  %v326_v33 = vld [vmem:[%s3264_s20 + $0xa0] sm:$0xff]  ;;  %v327_v37 = vld [vmem:[%s3264_s20 + $0xa8] sm:$0xff] }
  0x3b   : > { %2503 = vmatpush.msra.mxu2 %v380_v5  ;;  %2504 = vmatpush.msra.mxu3 %v380_v5  ;;  %v357_v31 = vld [vmem:[%s3264_s20 + $0x198] sm:$0xff]  ;;  %v342_v34 = vld [vmem:[%s3264_s20 + $0x120] sm:$0xff]  ;;  %v343_v38 = vld [vmem:[%s3264_s20 + $0x128] sm:$0xff] }
  0x3c   : > { %396 = vmatpush.msra.mxu0 %v379_v6  ;;  %2505 = vmatpush.msra.mxu1 %v379_v6  ;;  %v358_v35 = vld [vmem:[%s3264_s20 + $0x1a0] sm:$0xff]  ;;  %v359_v39 = vld [vmem:[%s3264_s20 + $0x1a8] sm:$0xff]  ;;  %v312_v40 = vld [vmem:[%s3264_s20 + $0x30] sm:$0xff] }
  0x3d   : > { %2506 = vmatpush.msra.mxu2 %v379_v6  ;;  %2507 = vmatpush.msra.mxu3 %v379_v6  ;;  %v328_v41 = vld [vmem:[%s3264_s20 + $0xb0] sm:$0xff]  ;;  %v313_v44 = vld [vmem:[%s3264_s20 + $0x38] sm:$0xff]  ;;  %v314_v48 = vld [vmem:[%s3264_s20 + $0x40] sm:$0xff] }
  0x3e   : > { %397 = vmatpush.msra.mxu0 %v378_v7  ;;  %2508 = vmatpush.msra.mxu1 %v378_v7  ;;  %v344_v42 = vld [vmem:[%s3264_s20 + $0x130] sm:$0xff]  ;;  %v329_v45 = vld [vmem:[%s3264_s20 + $0xb8] sm:$0xff]  ;;  %v330_v49 = vld [vmem:[%s3264_s20 + $0xc0] sm:$0xff] }
  0x3f   : > { %2509 = vmatpush.msra.mxu2 %v378_v7  ;;  %2510 = vmatpush.msra.mxu3 %v378_v7  ;;  %v360_v43 = vld [vmem:[%s3264_s20 + $0x1b0] sm:$0xff]  ;;  %v345_v46 = vld [vmem:[%s3264_s20 + $0x138] sm:$0xff]  ;;  %v346_v50 = vld [vmem:[%s3264_s20 + $0x140] sm:$0xff] }
  0x40   : > { %398 = vmatpush.msra.mxu0 %v377_v8  ;;  %2511 = vmatpush.msra.mxu1 %v377_v8  ;;  %v361_v47 = vld [vmem:[%s3264_s20 + $0x1b8] sm:$0xff]  ;;  %v362_v51 = vld [vmem:[%s3264_s20 + $0x1c0] sm:$0xff]  ;;  %v315_v52 = vld [vmem:[%s3264_s20 + $0x48] sm:$0xff] }
  0x41   : > { %2512 = vmatpush.msra.mxu2 %v377_v8  ;;  %2513 = vmatpush.msra.mxu3 %v377_v8  ;;  %v331_v53 = vld [vmem:[%s3264_s20 + $0xc8] sm:$0xff]  ;;  %v316_v56 = vld [vmem:[%s3264_s20 + $0x50] sm:$0xff]  ;;  %v317_v60 = vld [vmem:[%s3264_s20 + $0x58] sm:$0xff] }
  0x42   : > { %399 = vmatpush.msra.mxu0 %v376_v9  ;;  %2514 = vmatpush.msra.mxu1 %v376_v9  ;;  %v347_v54 = vld [vmem:[%s3264_s20 + $0x148] sm:$0xff]  ;;  %v332_v57 = vld [vmem:[%s3264_s20 + $0xd0] sm:$0xff]  ;;  %v333_v61 = vld [vmem:[%s3264_s20 + $0xd8] sm:$0xff] }
  0x43   : > { %2515 = vmatpush.msra.mxu2 %v376_v9  ;;  %2516 = vmatpush.msra.mxu3 %v376_v9  ;;  %v363_v55 = vld [vmem:[%s3264_s20 + $0x1c8] sm:$0xff]  ;;  %v348_v58 = vld [vmem:[%s3264_s20 + $0x150] sm:$0xff]  ;;  %v349_v62 = vld [vmem:[%s3264_s20 + $0x158] sm:$0xff] }
  0x44   : > { %400 = vmatpush.msra.mxu0 %v375_v10  ;;  %2517 = vmatpush.msra.mxu1 %v375_v10  ;;  %v364_v59 = vld [vmem:[%s3264_s20 + $0x1d0] sm:$0xff]  ;;  %v365_v63 = vld [vmem:[%s3264_s20 + $0x1d8] sm:$0xff]  ;;  %v318_v0 = vld [vmem:[%s3264_s20 + $0x60] sm:$0xff] }
  0x45   : > { %2518 = vmatpush.msra.mxu2 %v375_v10  ;;  %2519 = vmatpush.msra.mxu3 %v375_v10  ;;  %v350_v1 = vld [vmem:[%s3264_s20 + $0x160] sm:$0xff]  ;;  %v351_v4 = vld [vmem:[%s3264_s20 + $0x168] sm:$0xff]  ;;  %v352_v7 = vld [vmem:[%s3264_s20 + $0x170] sm:$0xff] }
  0x46   : > { %401 = vmatpush.msra.mxu0 %v374_v11  ;;  %2520 = vmatpush.msra.mxu1 %v374_v11  ;;  %v366_v2 = vld [vmem:[%s3264_s20 + $0x1e0] sm:$0xff]  ;;  %v319_v5 = vld [vmem:[%s3264_s20 + $0x68] sm:$0xff]  ;;  %v320_v9 = vld [vmem:[%s3264_s20 + $0x70] sm:$0xff] }
  0x47   : > { %2521 = vmatpush.msra.mxu2 %v374_v11  ;;  %2522 = vmatpush.msra.mxu3 %v374_v11  ;;  %v334_v3 = vld [vmem:[%s3264_s20 + $0xe0] sm:$0xff]  ;;  %v335_v6 = vld [vmem:[%s3264_s20 + $0xe8] sm:$0xff]  ;;  %v336_v10 = vld [vmem:[%s3264_s20 + $0xf0] sm:$0xff] }
  0x48   : > { %402 = vmatpush.msra.mxu0 %v373_v12  ;;  %2523 = vmatpush.msra.mxu1 %v373_v12  ;;  %v367_v8 = vld [vmem:[%s3264_s20 + $0x1e8] sm:$0xff]  ;;  %v353_v11 = vld [vmem:[%s3264_s20 + $0x178] sm:$0xff] }
  0x49   : > { %2524 = vmatpush.msra.mxu2 %v373_v12  ;;  %2525 = vmatpush.msra.mxu3 %v373_v12  ;;  %v3337_v12 = vld [vmem:[%s4924_s2] ss:$0 sm:$0xff] }
  0x4a   : > { %403 = vmatpush.msra.mxu0 %v372_v13  ;;  %2526 = vmatpush.msra.mxu1 %v372_v13 }
  0x4b   : > { %2527 = vmatpush.msra.mxu2 %v372_v13  ;;  %2528 = vmatpush.msra.mxu3 %v372_v13  ;;  %v368_v13 = vld [vmem:[%s3264_s20 + $0x1f0] sm:$0xff] }
  0x4c   : > { %404 = vmatpush.msra.mxu0 %v371_v14  ;;  %2529 = vmatpush.msra.mxu1 %v371_v14 }
  0x4d   : > { %2530 = vmatpush.msra.mxu2 %v371_v14  ;;  %2531 = vmatpush.msra.mxu3 %v371_v14 }
  0x4e   : > { %405 = vmatpush.msra.mxu0 %v370_v15  ;;  %2532 = vmatpush.msra.mxu1 %v370_v15 }
  0x4f   : > { %2533 = vmatpush.msra.mxu2 %v370_v15  ;;  %2534 = vmatpush.msra.mxu3 %v370_v15 }
  0x50   : > { %406 = vmatmul.f32.vlgmr.msra.gmra.mxu0 %v306_v16  ;;  %454 = vmatmul.f32.vlgmr.msra.gmra.mxu1 %v322_v17 }
  0x51   : > { %502 = vmatmul.f32.vlgmr.msra.gmra.mxu2 %v338_v18  ;;  %550 = vmatmul.f32.vlgmr.msra.gmra.mxu3 %v354_v19  ;;  %v337_v18 = vld [vmem:[%s3264_s20 + $0xf8] sm:$0xff] }
  0x52   : > { %v321_v19 = vld [vmem:[%s3264_s20 + $0x78] sm:$0xff] }
  0x58   : > { %409 = vmatmul.f32.gmra.mxu0 %v307_v20  ;;  %457 = vmatmul.f32.gmra.mxu1 %v323_v21  ;;  %v3347_v20 = vld [vmem:[%s4925_s3] ss:$0 sm:$0xff]  ;;  %v369_v21 = vld [vmem:[%s3264_s20 + $0x1f8] sm:$0xff] }
  0x59   : > { %505 = vmatmul.f32.gmra.mxu2 %v339_v22  ;;  %553 = vmatmul.f32.gmra.mxu3 %v355_v23 }
  0x60   : > { %412 = vmatmul.f32.gmra.mxu0 %v308_v24  ;;  %460 = vmatmul.f32.gmra.mxu1 %v324_v25 }
  0x61   : > { %508 = vmatmul.f32.gmra.mxu2 %v340_v26  ;;  %556 = vmatmul.f32.gmra.mxu3 %v356_v27 }
  0x68   : > { %415 = vmatmul.f32.gmra.mxu0 %v309_v28  ;;  %463 = vmatmul.f32.gmra.mxu1 %v325_v29 }
  0x69   : > { %511 = vmatmul.f32.gmra.mxu2 %v341_v30  ;;  %559 = vmatmul.f32.gmra.mxu3 %v357_v31 }
  0x70   : > { %418 = vmatmul.f32.gmra.mxu0 %v310_v32  ;;  %466 = vmatmul.f32.gmra.mxu1 %v326_v33 }
  0x71   : > { %514 = vmatmul.f32.gmra.mxu2 %v342_v34  ;;  %562 = vmatmul.f32.gmra.mxu3 %v358_v35 }
  0x78   : > { %421 = vmatmul.f32.gmra.mxu0 %v311_v36  ;;  %469 = vmatmul.f32.gmra.mxu1 %v327_v37 }
  0x79   : > { %517 = vmatmul.f32.gmra.mxu2 %v343_v38  ;;  %565 = vmatmul.f32.gmra.mxu3 %v359_v39 }
  0x80   : > { %424 = vmatmul.f32.gmra.mxu0 %v312_v40  ;;  %472 = vmatmul.f32.gmra.mxu1 %v328_v41 }
  0x81   : > { %520 = vmatmul.f32.gmra.mxu2 %v344_v42  ;;  %568 = vmatmul.f32.gmra.mxu3 %v360_v43 }
  0x88   : > { %427 = vmatmul.f32.gmra.mxu0 %v313_v44  ;;  %475 = vmatmul.f32.gmra.mxu1 %v329_v45 }
  0x89   : > { %523 = vmatmul.f32.gmra.mxu2 %v345_v46  ;;  %571 = vmatmul.f32.gmra.mxu3 %v361_v47 }
  0x90   : > { %430 = vmatmul.f32.gmra.mxu0 %v314_v48  ;;  %478 = vmatmul.f32.gmra.mxu1 %v330_v49 }
  0x91   : > { %526 = vmatmul.f32.gmra.mxu2 %v346_v50  ;;  %574 = vmatmul.f32.gmra.mxu3 %v362_v51 }
  0x98   : > { %433 = vmatmul.f32.gmra.mxu0 %v315_v52  ;;  %481 = vmatmul.f32.gmra.mxu1 %v331_v53 }
  0x99   : > { %529 = vmatmul.f32.gmra.mxu2 %v347_v54  ;;  %577 = vmatmul.f32.gmra.mxu3 %v363_v55 }
  0xa0   : > { %436 = vmatmul.f32.gmra.mxu0 %v316_v56  ;;  %484 = vmatmul.f32.gmra.mxu1 %v332_v57 }
  0xa1   : > { %532 = vmatmul.f32.gmra.mxu2 %v348_v58  ;;  %580 = vmatmul.f32.gmra.mxu3 %v364_v59 }
  0xa8   : > { %439 = vmatmul.f32.gmra.mxu0 %v317_v60  ;;  %487 = vmatmul.f32.gmra.mxu1 %v333_v61 }
  0xa9   : > { %535 = vmatmul.f32.gmra.mxu2 %v349_v62  ;;  %583 = vmatmul.f32.gmra.mxu3 %v365_v63 }
  0xb0   : > { %442 = vmatmul.f32.gmra.mxu0 %v318_v0  ;;  %490 = vmatmul.f32.gmra.mxu1 %v334_v3 }
  0xb1   : > { %538 = vmatmul.f32.gmra.mxu2 %v350_v1  ;;  %586 = vmatmul.f32.gmra.mxu3 %v366_v2 }
  0xb8   : > { %445 = vmatmul.f32.gmra.mxu0 %v319_v5  ;;  %493 = vmatmul.f32.gmra.mxu1 %v335_v6 }
  0xb9   : > { %541 = vmatmul.f32.gmra.mxu2 %v351_v4  ;;  %589 = vmatmul.f32.gmra.mxu3 %v367_v8 }
  0xc0   : > { %448 = vmatmul.f32.gmra.mxu0 %v320_v9  ;;  %496 = vmatmul.f32.gmra.mxu1 %v336_v10 }
  0xc1   : > { %544 = vmatmul.f32.gmra.mxu2 %v352_v7  ;;  %592 = vmatmul.f32.gmra.mxu3 %v368_v13 }
  0xc8   : > { %499 = vmatmul.f32.gmra.mxu1 %v337_v18  ;;  %451 = vmatmul.f32.gmra.mxu0 %v321_v19 }
  0xc9   : > { %547 = vmatmul.f32.gmra.mxu2 %v353_v11  ;;  %595 = vmatmul.f32.gmra.mxu3 %v369_v21 }
  0xcd   : > { %v407_v14 = vpop.f32.mrf.mxu0  ;;  %v455_v15 = vpop.f32.mrf.mxu1 }
  0xce   : > { %v408_v16 = vadd.f32 %v3337_v12, %v407_v14  ;;  %v456_v17 = vadd.f32 %v3337_v12, %v455_v15 }
  0xd0   : > { %2598 = vtanh.f32 %v408_v16 }
  0xd1   : > { %2600 = vtanh.f32 %v456_v17 }
  0xd4   : > { %v503_v22 = vpop.f32.mrf.mxu2  ;;  %v551_v23 = vpop.f32.mrf.mxu3 }
  0xd5   : > { %v504_v24 = vadd.f32 %v3337_v12, %v503_v22  ;;  %v552_v25 = vadd.f32 %v3337_v12, %v551_v23  ;;  %v410_v26 = vpop.f32.mrf.mxu0  ;;  %v458_v27 = vpop.f32.mrf.mxu1 }
  0xd6   : > { %v2599_v28 = vpop.eup %2598  ;;  %v411_v29 = vadd.f32 %v3337_v12, %v410_v26  ;;  %v459_v30 = vadd.f32 %v3337_v12, %v458_v27 }
  0xd7   : > { %v2601_v31 = vpop.eup %2600  ;;  %663 = vst [vmem:[%s3356_s10] sm:$0xff] %v2599_v28  ;;  %2602 = vtanh.f32 %v504_v24  ;;  %v731_v32 = vmul.f32 %v2599_v28, %v3347_v20 }
  0xd8   : > { %679 = vst [vmem:[%s3356_s10 + $0x80] sm:$0xff] %v2601_v31  ;;  %2604 = vtanh.f32 %v552_v25  ;;  %v747_v33 = vmul.f32 %v2601_v31, %v3347_v20 }
  0xd9   : > { %795 = vadd.xlane.f32.xlu0 %v731_v32  ;;  %2606 = vtanh.f32 %v411_v29 }
  0xda   : > { %827 = vadd.xlane.f32.xlu1 %v747_v33  ;;  %2608 = vtanh.f32 %v459_v30 }
  0xdc   : > { %v506_v34 = vpop.f32.mrf.mxu2  ;;  %v554_v35 = vpop.f32.mrf.mxu3 }
  0xdd   : > { %v2603_v36 = vpop.eup %2602  ;;  %v507_v37 = vadd.f32 %v3337_v12, %v506_v34  ;;  %v555_v38 = vadd.f32 %v3337_v12, %v554_v35  ;;  %v413_v39 = vpop.f32.mrf.mxu0 }
  0xde   : > { %v461_v40 = vpop.f32.mrf.mxu1  ;;  %v2605_v41 = vpop.eup %2604  ;;  %695 = vst [vmem:[%s3356_s10 + $0x100] sm:$0xff] %v2603_v36  ;;  %v763_v42 = vmul.f32 %v2603_v36, %v3347_v20  ;;  %v414_v43 = vadd.f32 %v3337_v12, %v413_v39 }
  0xdf   : > { %v462_v44 = vadd.f32 %v3337_v12, %v461_v40  ;;  %v2607_v45 = vpop.eup %2606  ;;  %711 = vst [vmem:[%s3356_s10 + $0x180] sm:$0xff] %v2605_v41  ;;  %2610 = vtanh.f32 %v507_v37  ;;  %v779_v46 = vmul.f32 %v2605_v41, %v3347_v20 }
  0xe0   : > { %v2609_v47 = vpop.eup %2608  ;;  %664 = vst [vmem:[%s3356_s10 + $0x8] sm:$0xff] %v2607_v45  ;;  %2612 = vtanh.f32 %v555_v38  ;;  %859 = vadd.xlane.f32.xlu2 %v763_v42  ;;  %v732_v54 = vmul.f32 %v2607_v45, %v3347_v20 }
  0xe1   : > { %680 = vst [vmem:[%s3356_s10 + $0x88] sm:$0xff] %v2609_v47  ;;  %891 = vadd.xlane.f32.xlu0 %v779_v46  ;;  %2614 = vtanh.f32 %v414_v43  ;;  %v748_v50 = vmul.f32 %v2609_v47, %v3347_v20 }
  0xe2   : > { %2616 = vtanh.f32 %v462_v44 }
  0xe4   : > { %v509_v48 = vpop.f32.mrf.mxu2  ;;  %v557_v49 = vpop.f32.mrf.mxu3 }
  0xe5   : > { %v2611_v51 = vpop.eup %2610  ;;  %v510_v52 = vadd.f32 %v3337_v12, %v509_v48  ;;  %v558_v53 = vadd.f32 %v3337_v12, %v557_v49  ;;  %v416_v55 = vpop.f32.mrf.mxu0 }
  0xe6   : > { %v464_v56 = vpop.f32.mrf.mxu1  ;;  %v2613_v57 = vpop.eup %2612  ;;  %696 = vst [vmem:[%s3356_s10 + $0x108] sm:$0xff] %v2611_v51  ;;  %v417_v58 = vadd.f32 %v3337_v12, %v416_v55  ;;  %v764_v14 = vmul.f32 %v2611_v51, %v3347_v20 }
  0xe7   : > { %v465_v59 = vadd.f32 %v3337_v12, %v464_v56  ;;  %v2615_v60 = vpop.eup %2614  ;;  %712 = vst [vmem:[%s3356_s10 + $0x188] sm:$0xff] %v2613_v57  ;;  %2618 = vtanh.f32 %v510_v52  ;;  %v780_v61 = vmul.f32 %v2613_v57, %v3347_v20 }
  0xe8   : > { %v2617_v62 = vpop.eup %2616  ;;  %665 = vst [vmem:[%s3356_s10 + $0x10] sm:$0xff] %v2615_v60  ;;  %2620 = vtanh.f32 %v558_v53  ;;  %829 = vadd.xlane.f32.xlu2 %v748_v50  ;;  %v733_v3 = vmul.f32 %v2615_v60, %v3347_v20 }
  0xe9   : > { %893 = vadd.xlane.f32.xlu1 %v780_v61  ;;  %797 = vadd.xlane.f32.xlu0 %v732_v54  ;;  %2622 = vtanh.f32 %v417_v58  ;;  %681 = vst [vmem:[%s3356_s10 + $0x90] sm:$0xff] %v2617_v62  ;;  %v749_v25 = vmul.f32 %v2617_v62, %v3347_v20 }
  0xea   : > { %2624 = vtanh.f32 %v465_v59 }
  0xec   : > { %v512_v63 = vpop.f32.mrf.mxu2  ;;  %v560_v0 = vpop.f32.mrf.mxu3 }
  0xed   : > { %v2619_v1 = vpop.eup %2618  ;;  %v513_v2 = vadd.f32 %v3337_v12, %v512_v63  ;;  %v419_v4 = vpop.f32.mrf.mxu0  ;;  %v561_v5 = vadd.f32 %v3337_v12, %v560_v0 }
  0xee   : > { %v467_v6 = vpop.f32.mrf.mxu1  ;;  %v2621_v7 = vpop.eup %2620  ;;  %697 = vst [vmem:[%s3356_s10 + $0x110] sm:$0xff] %v2619_v1  ;;  %v420_v8 = vadd.f32 %v3337_v12, %v419_v4  ;;  %v765_v29 = vmul.f32 %v2619_v1, %v3347_v20 }
  0xef   : > { %v468_v9 = vadd.f32 %v3337_v12, %v467_v6  ;;  %v2623_v10 = vpop.eup %2622  ;;  %713 = vst [vmem:[%s3356_s10 + $0x190] sm:$0xff] %v2621_v7  ;;  %2626 = vtanh.f32 %v513_v2  ;;  %v781_v11 = vmul.f32 %v2621_v7, %v3347_v20 }
  0xf0   : > { %v3391_v13 = vpop.eup %2624  ;;  %666 = vst [vmem:[%s3356_s10 + $0x18] sm:$0xff] %v2623_v10  ;;  %2628 = vtanh.f32 %v420_v8  ;;  %v734_v44 = vmul.f32 %v2623_v10, %v3347_v20 }
  0xf1   : > { %895 = vadd.xlane.f32.xlu2 %v781_v11  ;;  %799 = vadd.xlane.f32.xlu1 %v733_v3  ;;  %682 = vst [vmem:[%s3356_s10 + $0x98] sm:$0xff] %v3391_v13  ;;  %2630 = vtanh.f32 %v561_v5  ;;  %v750_v59 = vmul.f32 %v3391_v13, %v3347_v20 }
  0xf2   : > { %861 = vadd.xlane.f32.xlu0 %v764_v14  ;;  %2632 = vtanh.f32 %v468_v9 }
  0xf4   : > { %v515_v15 = vpop.f32.mrf.mxu2  ;;  %v563_v16 = vpop.f32.mrf.mxu3 }
  0xf5   : > { %v2627_v17 = vpop.eup %2626  ;;  %v516_v18 = vadd.f32 %v3337_v12, %v515_v15  ;;  %v422_v19 = vpop.f32.mrf.mxu0  ;;  %v564_v21 = vadd.f32 %v3337_v12, %v563_v16 }
  0xf6   : > { %v470_v22 = vpop.f32.mrf.mxu1  ;;  %v2629_v23 = vpop.eup %2628  ;;  %698 = vst [vmem:[%s3356_s10 + $0x118] sm:$0xff] %v2627_v17  ;;  %v766_v24 = vmul.f32 %v2627_v17, %v3347_v20  ;;  %v423_v26 = vadd.f32 %v3337_v12, %v422_v19 }
  0xf7   : > { %v471_v27 = vadd.f32 %v3337_v12, %v470_v22  ;;  %v2631_v28 = vpop.eup %2630  ;;  %667 = vst [vmem:[%s3356_s10 + $0x20] sm:$0xff] %v2629_v23  ;;  %2634 = vtanh.f32 %v516_v18  ;;  %v735_v34 = vmul.f32 %v2629_v23, %v3347_v20 }
  0xf8   : > { %v2633_v30 = vpop.eup %2632  ;;  %714 = vst [vmem:[%s3356_s10 + $0x198] sm:$0xff] %v2631_v28  ;;  %2636 = vtanh.f32 %v423_v26  ;;  %v782_v40 = vmul.f32 %v2631_v28, %v3347_v20 }
  0xf9   : > { %865 = vadd.xlane.f32.xlu2 %v766_v24  ;;  %863 = vadd.xlane.f32.xlu1 %v765_v29  ;;  %683 = vst [vmem:[%s3356_s10 + $0xa0] sm:$0xff] %v2633_v30  ;;  %2638 = vtanh.f32 %v564_v21  ;;  %v751_v49 = vmul.f32 %v2633_v30, %v3347_v20 }
  0xfa   : > { %831 = vadd.xlane.f32.xlu0 %v749_v25  ;;  %2640 = vtanh.f32 %v471_v27 }
  0xfc   : > { %v518_v31 = vpop.f32.mrf.mxu2  ;;  %v566_v32 = vpop.f32.mrf.mxu3 }
  0xfd   : > { %v2635_v33 = vpop.eup %2634  ;;  %v519_v35 = vadd.f32 %v3337_v12, %v518_v31  ;;  %v567_v36 = vadd.f32 %v3337_v12, %v566_v32  ;;  %v425_v37 = vpop.f32.mrf.mxu0 }
  0xfe   : > { %v473_v38 = vpop.f32.mrf.mxu1  ;;  %v2637_v39 = vpop.eup %2636  ;;  %699 = vst [vmem:[%s3356_s10 + $0x120] sm:$0xff] %v2635_v33  ;;  %v426_v41 = vadd.f32 %v3337_v12, %v425_v37  ;;  %v767_v55 = vmul.f32 %v2635_v33, %v3347_v20 }
  0xff   : > { %v474_v42 = vadd.f32 %v3337_v12, %v473_v38  ;;  %v2639_v43 = vpop.eup %2638  ;;  %668 = vst [vmem:[%s3356_s10 + $0x28] sm:$0xff] %v2637_v39  ;;  %2642 = vtanh.f32 %v519_v35  ;;  %v736_v0 = vmul.f32 %v2637_v39, %v3347_v20 }
 0x100   : > { %v2641_v45 = vpop.eup %2640  ;;  %715 = vst [vmem:[%s3356_s10 + $0x1a0] sm:$0xff] %v2639_v43  ;;  %2644 = vtanh.f32 %v567_v36  ;;  %v783_v1 = vmul.f32 %v2639_v43, %v3347_v20 }
 0x101   : > { %803 = vadd.xlane.f32.xlu2 %v735_v34  ;;  %801 = vadd.xlane.f32.xlu1 %v734_v44  ;;  %684 = vst [vmem:[%s3356_s10 + $0xa8] sm:$0xff] %v2641_v45  ;;  %2646 = vtanh.f32 %v426_v41  ;;  %v752_v7 = vmul.f32 %v2641_v45, %v3347_v20 }
 0x102   : > { %897 = vadd.xlane.f32.xlu0 %v782_v40  ;;  %2648 = vtanh.f32 %v474_v42 }
 0x104   : > { %v521_v46 = vpop.f32.mrf.mxu2  ;;  %v569_v47 = vpop.f32.mrf.mxu3 }
 0x105   : > { %v2643_v48 = vpop.eup %2642  ;;  %v522_v50 = vadd.f32 %v3337_v12, %v521_v46  ;;  %v570_v51 = vadd.f32 %v3337_v12, %v569_v47  ;;  %v428_v52 = vpop.f32.mrf.mxu0 }
 0x106   : > { %v476_v53 = vpop.f32.mrf.mxu1  ;;  %v2645_v54 = vpop.eup %2644  ;;  %700 = vst [vmem:[%s3356_s10 + $0x128] sm:$0xff] %v2643_v48  ;;  %v429_v56 = vadd.f32 %v3337_v12, %v428_v52  ;;  %v768_v17 = vmul.f32 %v2643_v48, %v3347_v20 }
 0x107   : > { %v477_v57 = vadd.f32 %v3337_v12, %v476_v53  ;;  %v2647_v58 = vpop.eup %2646  ;;  %716 = vst [vmem:[%s3356_s10 + $0x1a8] sm:$0xff] %v2645_v54  ;;  %2650 = vtanh.f32 %v522_v50  ;;  %v784_v16 = vmul.f32 %v2645_v54, %v3347_v20 }
 0x108   : > { %v3429_v60 = vpop.eup %2648  ;;  %669 = vst [vmem:[%s3356_s10 + $0x30] sm:$0xff] %v2647_v58  ;;  %2652 = vtanh.f32 %v570_v51  ;;  %v737_v24 = vmul.f32 %v2647_v58, %v3347_v20 }
 0x109   : > { %835 = vadd.xlane.f32.xlu2 %v751_v49  ;;  %833 = vadd.xlane.f32.xlu1 %v750_v59  ;;  %685 = vst [vmem:[%s3356_s10 + $0xb0] sm:$0xff] %v3429_v60  ;;  %2654 = vtanh.f32 %v429_v56  ;;  %v753_v33 = vmul.f32 %v3429_v60, %v3347_v20 }
 0x10a   : > { %867 = vadd.xlane.f32.xlu0 %v767_v55  ;;  %2656 = vtanh.f32 %v477_v57 }
 0x10c   : > { %v524_v61 = vpop.f32.mrf.mxu2  ;;  %v572_v62 = vpop.f32.mrf.mxu3 }
 0x10d   : > { %v2651_v63 = vpop.eup %2650  ;;  %v525_v2 = vadd.f32 %v3337_v12, %v524_v61  ;;  %v431_v3 = vpop.f32.mrf.mxu0  ;;  %v573_v4 = vadd.f32 %v3337_v12, %v572_v62 }
 0x10e   : > { %v479_v5 = vpop.f32.mrf.mxu1  ;;  %v2653_v6 = vpop.eup %2652  ;;  %701 = vst [vmem:[%s3356_s10 + $0x130] sm:$0xff] %v2651_v63  ;;  %v432_v8 = vadd.f32 %v3337_v12, %v431_v3  ;;  %v769_v32 = vmul.f32 %v2651_v63, %v3347_v20 }
 0x10f   : > { %v480_v9 = vadd.f32 %v3337_v12, %v479_v5  ;;  %v3442_v10 = vpop.eup %2654  ;;  %717 = vst [vmem:[%s3356_s10 + $0x1b0] sm:$0xff] %v2653_v6  ;;  %2658 = vtanh.f32 %v525_v2  ;;  %v785_v39 = vmul.f32 %v2653_v6, %v3347_v20 }
 0x110   : > { %v3445_v11 = vpop.eup %2656  ;;  %670 = vst [vmem:[%s3356_s10 + $0x38] sm:$0xff] %v3442_v10  ;;  %2660 = vtanh.f32 %v432_v8  ;;  %v738_v48 = vmul.f32 %v3442_v10, %v3347_v20 }
 0x111   : > { %805 = vadd.xlane.f32.xlu2 %v736_v0  ;;  %899 = vadd.xlane.f32.xlu1 %v783_v1  ;;  %686 = vst [vmem:[%s3356_s10 + $0xb8] sm:$0xff] %v3445_v11  ;;  %2662 = vtanh.f32 %v573_v4  ;;  %v754_v47 = vmul.f32 %v3445_v11, %v3347_v20 }
 0x112   : > { %837 = vadd.xlane.f32.xlu0 %v752_v7  ;;  %2664 = vtanh.f32 %v480_v9 }
 0x114   : > { %v527_v13 = vpop.f32.mrf.mxu2  ;;  %v575_v14 = vpop.f32.mrf.mxu3 }
 0x115   : > { %v2659_v15 = vpop.eup %2658  ;;  %v528_v18 = vadd.f32 %v3337_v12, %v527_v13  ;;  %v576_v19 = vadd.f32 %v3337_v12, %v575_v14  ;;  %v434_v21 = vpop.f32.mrf.mxu0 }
 0x116   : > { %v482_v22 = vpop.f32.mrf.mxu1  ;;  %v3455_v23 = vpop.eup %2660  ;;  %702 = vst [vmem:[%s3356_s10 + $0x138] sm:$0xff] %v2659_v15  ;;  %v435_v25 = vadd.f32 %v3337_v12, %v434_v21  ;;  %v770_v54 = vmul.f32 %v2659_v15, %v3347_v20 }
 0x117   : > { %v483_v26 = vadd.f32 %v3337_v12, %v482_v22  ;;  %v3461_v27 = vpop.eup %2662  ;;  %671 = vst [vmem:[%s3356_s10 + $0x40] sm:$0xff] %v3455_v23  ;;  %2666 = vtanh.f32 %v528_v18  ;;  %v739_v62 = vmul.f32 %v3455_v23, %v3347_v20 }
 0x118   : > { %v3465_v28 = vpop.eup %2664  ;;  %718 = vst [vmem:[%s3356_s10 + $0x1b8] sm:$0xff] %v3461_v27  ;;  %2668 = vtanh.f32 %v576_v19  ;;  %v786_v63 = vmul.f32 %v3461_v27, %v3347_v20 }
 0x119   : > { %901 = vadd.xlane.f32.xlu2 %v784_v16  ;;  %869 = vadd.xlane.f32.xlu1 %v768_v17  ;;  %687 = vst [vmem:[%s3356_s10 + $0xc0] sm:$0xff] %v3465_v28  ;;  %2670 = vtanh.f32 %v435_v25  ;;  %v755_v3 = vmul.f32 %v3465_v28, %v3347_v20 }
 0x11a   : > { %807 = vadd.xlane.f32.xlu0 %v737_v24  ;;  %2672 = vtanh.f32 %v483_v26 }
 0x11c   : > { %v530_v29 = vpop.f32.mrf.mxu2  ;;  %v578_v30 = vpop.f32.mrf.mxu3 }
 0x11d   : > { %v3471_v31 = vpop.eup %2666  ;;  %v531_v34 = vadd.f32 %v3337_v12, %v530_v29  ;;  %v579_v35 = vadd.f32 %v3337_v12, %v578_v30  ;;  %v437_v36 = vpop.f32.mrf.mxu0 }
 0x11e   : > { %v485_v37 = vpop.f32.mrf.mxu1  ;;  %v3478_v38 = vpop.eup %2668  ;;  %703 = vst [vmem:[%s3356_s10 + $0x140] sm:$0xff] %v3471_v31  ;;  %v438_v40 = vadd.f32 %v3337_v12, %v437_v36  ;;  %v771_v10 = vmul.f32 %v3471_v31, %v3347_v20 }
 0x11f   : > { %v486_v41 = vadd.f32 %v3337_v12, %v485_v37  ;;  %v3485_v42 = vpop.eup %2670  ;;  %719 = vst [vmem:[%s3356_s10 + $0x1c0] sm:$0xff] %v3478_v38  ;;  %2674 = vtanh.f32 %v531_v34  ;;  %v787_v9 = vmul.f32 %v3478_v38, %v3347_v20  ;;  %v3595_v38 = vstv %s923_s11  ;;  %s2291_s11 = scalar_lea.hbm %s4928_s6, %s2486_s9 }
 0x120   : > { %v3489_v43 = vpop.eup %2672  ;;  %672 = vst [vmem:[%s3356_s10 + $0x48] sm:$0xff] %v3485_v42  ;;  %2676 = vtanh.f32 %v579_v35  ;;  %v740_v15 = vmul.f32 %v3485_v42, %v3347_v20  ;;  %s2294_s4 = sshll.u32 %s2291_s11, 4  ;;  %s4370_s4 = int_to_ptr.hbm [resolvable:$true] %s2294_s4 }
 0x121   : > { %871 = vadd.xlane.f32.xlu2 %v769_v32  ;;  %839 = vadd.xlane.f32.xlu1 %v753_v33  ;;  %688 = vst [vmem:[%s3356_s10 + $0xc8] sm:$0xff] %v3489_v43  ;;  %2678 = vtanh.f32 %v438_v40  ;;  %v756_v23 = vmul.f32 %v3489_v43, %v3347_v20  ;;  %s3058_s22 = sshra.s32 %s4370_s4, 4  ;;  %s3059_s22 = int_to_ptr.hbm [resolvable:$true] %s3058_s22 }
 0x122   : > { %903 = vadd.xlane.f32.xlu0 %v785_v39  ;;  %2680 = vtanh.f32 %v486_v41  ;;  %s3060_s21 = scalar_lea.hbm %s3059_s22, 512  ;;  %p3065_p9 = scmp.lt.s32.totalorder %s3059_s22, %s4928_s6 }
 0x123   : > { %p3061_p4 = scmp.ne.s32.totalorder %s3059_s22, %s3060_s21  ;;  %p3066_p2 = scmp.lt.s32.totalorder %s3064_s13, %s3060_s21 }
 0x124   : > { %v533_v44 = vpop.f32.mrf.mxu2  ;;  %v581_v45 = vpop.f32.mrf.mxu3 }
 0x125   : > { %v3495_v46 = vpop.eup %2674  ;;  %v534_v49 = vadd.f32 %v3337_v12, %v533_v44  ;;  %v440_v50 = vpop.f32.mrf.mxu0  ;;  %v582_v51 = vadd.f32 %v3337_v12, %v581_v45  ;;  %p3062_p8 = pnand %p3061_p4, %p3228_p3  ;;  %p3067_p10 = por %p3066_p2, %p3065_p9 }
 0x126   : > { %v488_v52 = vpop.f32.mrf.mxu1  ;;  %v3503_v53 = vpop.eup %2676  ;;  %704 = vst [vmem:[%s3356_s10 + $0x148] sm:$0xff] %v3495_v46  ;;  %v441_v55 = vadd.f32 %v3337_v12, %v440_v50  ;;  %v772_v22 = vmul.f32 %v3495_v46, %v3347_v20 }
 0x127   : > { %v489_v56 = vadd.f32 %v3337_v12, %v488_v52  ;;  %v3510_v57 = vpop.eup %2678  ;;  %720 = vst [vmem:[%s3356_s10 + $0x1c8] sm:$0xff] %v3503_v53  ;;  %2682 = vtanh.f32 %v534_v49  ;;  %v788_v25 = vmul.f32 %v3503_v53, %v3347_v20  ;;  %p3063_p11 = pneg %p3062_p8 }
 0x128   : > { %v3514_v58 = vpop.eup %2680  ;;  %673 = vst [vmem:[%s3356_s10 + $0x50] sm:$0xff] %v3510_v57  ;;  %2684 = vtanh.f32 %v441_v55  ;;  %v741_v35 = vmul.f32 %v3510_v57, %v3347_v20 }
 0x129   : > { %841 = vadd.xlane.f32.xlu2 %v754_v47  ;;  %809 = vadd.xlane.f32.xlu1 %v738_v48  ;;  %689 = vst [vmem:[%s3356_s10 + $0xd0] sm:$0xff] %v3514_v58  ;;  %2686 = vtanh.f32 %v582_v51  ;;  %v757_v34 = vmul.f32 %v3514_v58, %v3347_v20  ;;  %p3068_p12 = pnand %p3067_p10, %p3063_p11 }
 0x12a   : > { %873 = vadd.xlane.f32.xlu0 %v770_v54  ;;  %2688 = vtanh.f32 %v489_v56 }
 0x12c   : > { %v536_v59 = vpop.f32.mrf.mxu2  ;;  %v584_v60 = vpop.f32.mrf.mxu3 }
 0x12d   : > { %v3520_v61 = vpop.eup %2682  ;;  %v537_v0 = vadd.f32 %v3337_v12, %v536_v59  ;;  %v585_v1 = vadd.f32 %v3337_v12, %v584_v60  ;;  %v443_v5 = vpop.f32.mrf.mxu0 }
 0x12e   : > { %v3528_v2 = vpop.eup %2684  ;;  %705 = vst [vmem:[%s3356_s10 + $0x150] sm:$0xff] %v3520_v61  ;;  %v444_v7 = vadd.f32 %v3337_v12, %v443_v5  ;;  %v491_v11 = vpop.f32.mrf.mxu1  ;;  %v773_v36 = vmul.f32 %v3520_v61, %v3347_v20 }
 0x12f   : > { %v3534_v4 = vpop.eup %2686  ;;  %674 = vst [vmem:[%s3356_s10 + $0x58] sm:$0xff] %v3528_v2  ;;  %2690 = vtanh.f32 %v537_v0  ;;  %v492_v16 = vadd.f32 %v3337_v12, %v491_v11  ;;  %v742_v47 = vmul.f32 %v3528_v2, %v3347_v20 }
 0x130   : > { %v3538_v6 = vpop.eup %2688  ;;  %721 = vst [vmem:[%s3356_s10 + $0x1d0] sm:$0xff] %v3534_v4  ;;  %2692 = vtanh.f32 %v585_v1  ;;  %v789_v48 = vmul.f32 %v3534_v4, %v3347_v20 }
 0x131   : > { %811 = vadd.xlane.f32.xlu2 %v739_v62  ;;  %905 = vadd.xlane.f32.xlu1 %v786_v63  ;;  %690 = vst [vmem:[%s3356_s10 + $0xd8] sm:$0xff] %v3538_v6  ;;  %2694 = vtanh.f32 %v444_v7  ;;  %v758_v52 = vmul.f32 %v3538_v6, %v3347_v20 }
 0x132   : > { %843 = vadd.xlane.f32.xlu0 %v755_v3  ;;  %2696 = vtanh.f32 %v492_v16 }
 0x134   : > { %v539_v13 = vpop.f32.mrf.mxu2  ;;  %v587_v18 = vpop.f32.mrf.mxu3 }
 0x135   : > { %v3545_v8 = vpop.eup %2690  ;;  %v540_v17 = vadd.f32 %v3337_v12, %v539_v13  ;;  %v588_v21 = vadd.f32 %v3337_v12, %v587_v18  ;;  %v446_v28 = vpop.f32.mrf.mxu0 }
 0x136   : > { %v3551_v14 = vpop.eup %2692  ;;  %706 = vst [vmem:[%s3356_s10 + $0x158] sm:$0xff] %v3545_v8  ;;  %v494_v29 = vpop.f32.mrf.mxu1  ;;  %v447_v30 = vadd.f32 %v3337_v12, %v446_v28  ;;  %v774_v1 = vmul.f32 %v3545_v8, %v3347_v20 }
 0x137   : > { %722 = vst [vmem:[%s3356_s10 + $0x1d8] sm:$0xff] %v3551_v14  ;;  %v3561_v19 = vpop.eup %2694  ;;  %2698 = vtanh.f32 %v540_v17  ;;  %v495_v31 = vadd.f32 %v3337_v12, %v494_v29  ;;  %v790_v0 = vmul.f32 %v3551_v14, %v3347_v20 }
 0x138   : > { %675 = vst [vmem:[%s3356_s10 + $0x60] sm:$0xff] %v3561_v19  ;;  %2700 = vtanh.f32 %v588_v21  ;;  %v3570_v24 = vpop.eup %2696  ;;  %v743_v4 = vmul.f32 %v3561_v19, %v3347_v20 }
 0x139   : > { %907 = vadd.xlane.f32.xlu2 %v787_v9  ;;  %875 = vadd.xlane.f32.xlu1 %v771_v10  ;;  %691 = vst [vmem:[%s3356_s10 + $0xe0] sm:$0xff] %v3570_v24  ;;  %2702 = vtanh.f32 %v447_v30  ;;  %v759_v18 = vmul.f32 %v3570_v24, %v3347_v20 }
 0x13a   : > { %813 = vadd.xlane.f32.xlu0 %v740_v15  ;;  %2704 = vtanh.f32 %v495_v31 }
 0x13c   : > { %v542_v32 = vpop.f32.mrf.mxu2  ;;  %v590_v56 = vpop.f32.mrf.mxu3 }
 0x13d   : > { %v3574_v26 = vpop.eup %2698  ;;  %v543_v33 = vadd.f32 %v3337_v12, %v542_v32  ;;  %v449_v40 = vpop.f32.mrf.mxu0  ;;  %v591_v57 = vadd.f32 %v3337_v12, %v590_v56 }
 0x13e   : > { %v3578_v27 = vpop.eup %2700  ;;  %707 = vst [vmem:[%s3356_s10 + $0x160] sm:$0xff] %v3574_v26  ;;  %v450_v43 = vadd.f32 %v3337_v12, %v449_v40  ;;  %v497_v49 = vpop.f32.mrf.mxu1  ;;  %v775_v16 = vmul.f32 %v3574_v26, %v3347_v20 }
 0x13f   : > { %723 = vst [vmem:[%s3356_s10 + $0x1e0] sm:$0xff] %v3578_v27  ;;  %2706 = vtanh.f32 %v543_v33  ;;  %v3593_v37 = vpop.eup %2702  ;;  %v498_v53 = vadd.f32 %v3337_v12, %v497_v49  ;;  %v791_v19 = vmul.f32 %v3578_v27, %v3347_v20 }
 0x140   : > { %v3597_v39 = vpop.eup %2704  ;;  %676 = vst [vmem:[%s3356_s10 + $0x68] sm:$0xff] %v3593_v37  ;;  %2708 = vtanh.f32 %v450_v43  ;;  %v744_v31 = vmul.f32 %v3593_v37, %v3347_v20 }
 0x141   : > { %877 = vadd.xlane.f32.xlu2 %v772_v22  ;;  %845 = vadd.xlane.f32.xlu1 %v756_v23  ;;  %692 = vst [vmem:[%s3356_s10 + $0xe8] sm:$0xff] %v3597_v39  ;;  %v3666_v21 = vmul.f32 %v3597_v39, %v3347_v20 }
 0x142   : > { %909 = vadd.xlane.f32.xlu0 %v788_v25 }
 0x144   : > { %v545_v44 = vpop.f32.mrf.mxu2 }
 0x145   : > { %v3601_v41 = vpop.eup %2706  ;;  %v546_v50 = vadd.f32 %v3337_v12, %v545_v44 }
 0x146   : > { %708 = vst [vmem:[%s3356_s10 + $0x168] sm:$0xff] %v3601_v41  ;;  %v3619_v59 = vpop.eup %2708  ;;  %v500_v39 = vpop.f32.mrf.mxu1 }
 0x147   : > { %2710 = vtanh.f32 %v546_v50  ;;  %677 = vst [vmem:[%s3356_s10 + $0x70] sm:$0xff] %v3619_v59 }
 0x148   : > { %2712 = vtanh.f32 %v498_v53 }
 0x149   : > { %847 = vadd.xlane.f32.xlu2 %v757_v34  ;;  %815 = vadd.xlane.f32.xlu1 %v741_v35  ;;  %v776_v34 = vmul.f32 %v3601_v41, %v3347_v20 }
 0x14a   : > { %879 = vadd.xlane.f32.xlu0 %v773_v36 }
 0x14c   : > { %v796_v42 = vpop.xlane.xlu0 %795  ;;  %v548_v40 = vpop.f32.mrf.mxu2 }
 0x14d   : > { %v828_v45 = vpop.xlane.xlu1 %827  ;;  %v925_v46 = vadd.f32 %v3595_v38, %v796_v42  ;;  %v3622_v62 = vpop.eup %2710 }
 0x14e   : > { %v941_v51 = vadd.f32 %v3595_v38, %v828_v45  ;;  %v3631_v2 = vpop.eup %2712  ;;  %709 = vst [vmem:[%s3356_s10 + $0x170] sm:$0xff] %v3622_v62 }
 0x14f   : > { %v2416_v54 = vmul.f32 -1.442695, %v925_v46  ;;  %693 = vst [vmem:[%s3356_s10 + $0xf0] sm:$0xff] %v3631_v2 }
 0x150   : > { %v2432_v55 = vmul.f32 -1.442695, %v941_v51  ;;  %v3709_v51 = vadd.f32 %v3337_v12, %v500_v39 }
 0x151   : > { %2714 = vpow2.f32 %v2416_v54  ;;  %817 = vadd.xlane.f32.xlu2 %v742_v47  ;;  %911 = vadd.xlane.f32.xlu1 %v789_v48 }
 0x152   : > { %2716 = vpow2.f32 %v2432_v55  ;;  %849 = vadd.xlane.f32.xlu0 %v758_v52  ;;  %v3712_v52 = vadd.f32 %v3337_v12, %v548_v40 }
 0x153   : > { %v860_v58 = vpop.xlane.xlu2 %859  ;;  %2718 = vtanh.f32 %v591_v57 }
 0x154   : > { %v957_v60 = vadd.f32 %v3595_v38, %v860_v58  ;;  %v892_v61 = vpop.xlane.xlu0 %891 }
 0x155   : > { %v973_v63 = vadd.f32 %v3595_v38, %v892_v61 }
 0x156   : > { %v2448_v3 = vmul.f32 -1.442695, %v957_v60 }
 0x157   : > { %v2715_v5 = vpop.eup %2714  ;;  %v2464_v6 = vmul.f32 -1.442695, %v973_v63 }
 0x158   : > { %v2717_v7 = vpop.eup %2716  ;;  %v3639_v9 = vadd.f32 1.0, %v2715_v5  ;;  %2720 = vpow2.f32 %v2448_v3 }
 0x159   : > { %v3641_v8 = vpop.eup %2718  ;;  %v3643_v10 = vadd.f32 1.0, %v2717_v7  ;;  %2722 = vpow2.f32 %v2464_v6  ;;  %913 = vadd.xlane.f32.xlu2 %v790_v0  ;;  %881 = vadd.xlane.f32.xlu1 %v774_v1 }
 0x15a   : > { %2724 = vrcp.f32 %v3639_v9  ;;  %819 = vadd.xlane.f32.xlu0 %v743_v4  ;;  %724 = vst [vmem:[%s3356_s10 + $0x1e8] sm:$0xff] %v3641_v8  ;;  %v1254_v23 = vand.u32 2147483647, %v3639_v9  ;;  %v1256_v25 = vand.u32 2147483648, %v3639_v9  ;;  %vm1250_vm1 = vweird.f32 %v3639_v9 }
 0x15b   : > { %2726 = vrcp.f32 %v3643_v10  ;;  %v830_v11 = vpop.xlane.xlu2 %829  ;;  %v1494_v24 = vand.u32 2147483647, %v3643_v10  ;;  %v1496_v30 = vand.u32 2147483648, %v3643_v10  ;;  %vm1490_vm2 = vweird.f32 %v3643_v10 }
 0x15c   : > { %v942_v13 = vadd.f32 %v3595_v38, %v830_v11  ;;  %v894_v14 = vpop.xlane.xlu1 %893  ;;  %v798_v15 = vpop.xlane.xlu0 %797  ;;  %vm3698_vm3 = vcmp.eq.f32.partialorder %v1254_v23, 8.507059e+37  ;;  %v1257_v42 = vor.u32 1.1754944e-38, %v1256_v25 }
 0x15d   : > { %v974_v17 = vadd.f32 %v3595_v38, %v894_v14  ;;  %v926_v28 = vadd.f32 %v3595_v38, %v798_v15  ;;  %vm3702_vm4 = vcmp.eq.f32.partialorder %v1494_v24, 8.507059e+37  ;;  %v1497_v45 = vor.u32 1.1754944e-38, %v1496_v30 }
 0x15e   : > { %v2721_v22 = vpop.eup %2720  ;;  %v2433_v26 = vmul.f32 -1.442695, %v942_v13 }
 0x15f   : > { %v2723_v29 = vpop.eup %2722  ;;  %v3673_v27 = vadd.f32 1.0, %v2721_v22  ;;  %v2465_v37 = vmul.f32 -1.442695, %v974_v17  ;;  %v2417_v43 = vmul.f32 -1.442695, %v926_v28 }
 0x160   : > { %v3677_v32 = vpop.eup %2724  ;;  %v3680_v33 = vadd.f32 1.0, %v2723_v29  ;;  %2728 = vpow2.f32 %v2433_v26 }
 0x161   : > { %v3684_v35 = vpop.eup %2726  ;;  %v1246_v36 = vmul.f32 %v3677_v32, %v3639_v9  ;;  %2730 = vrcp.f32 %v3673_v27  ;;  %883 = vadd.xlane.f32.xlu2 %v775_v16  ;;  %851 = vadd.xlane.f32.xlu1 %v759_v18  ;;  %v1734_v48 = vand.u32 2147483647, %v3673_v27  ;;  %vm1251_vm5 = vweird.f32 %v3677_v32 }
 0x162   : > { %v1486_v20 = vmul.f32 %v3684_v35, %v3643_v10  ;;  %915 = vadd.xlane.f32.xlu0 %v791_v19  ;;  %2732 = vrcp.f32 %v3680_v33  ;;  %vm1491_vm6 = vweird.f32 %v3684_v35  ;;  %vm1730_vm7 = vweird.f32 %v3673_v27  ;;  %vm1252_vm8 = vmor %vm1250_vm1, %vm1251_vm5 }
 0x163   : > { %v1247_v46 = vsub.f32 1.0, %v1246_v36  ;;  %2734 = vpow2.f32 %v2465_v37  ;;  %v1736_v61 = vand.u32 2147483648, %v3673_v27  ;;  %v1974_v63 = vand.u32 2147483647, %v3680_v33  ;;  %vm1492_vm11 = vmor %vm1490_vm2, %vm1491_vm6 }
 0x164   : > { %v1487_v47 = vsub.f32 1.0, %v1486_v20  ;;  %v896_v49 = vpop.xlane.xlu2 %895  ;;  %v800_v50 = vpop.xlane.xlu1 %799  ;;  %2736 = vpow2.f32 %v2417_v43  ;;  %vm3738_vm9 = vcmp.eq.f32.partialorder %v1734_v48, 8.507059e+37  ;;  %vm1970_vm10 = vweird.f32 %v3680_v33 }
 0x165   : > { %v1248_v53 = vmul.f32 %v3677_v32, %v1247_v46  ;;  %v975_v54 = vadd.f32 %v3595_v38, %v896_v49  ;;  %v927_v57 = vadd.f32 %v3595_v38, %v800_v50  ;;  %v862_v12 = vpop.xlane.xlu0 %861  ;;  %v1737_v18 = vor.u32 1.1754944e-38, %v1736_v61 }
 0x166   : > { %v2729_v55 = vpop.eup %2728  ;;  %v1488_v56 = vmul.f32 %v3684_v35, %v1487_v47  ;;  %v958_v11 = vadd.f32 %v3595_v38, %v862_v12  ;;  %v1976_v19 = vand.u32 2147483648, %v3680_v33  ;;  %vm3771_vm15 = vcmp.eq.f32.partialorder %v1974_v63, 8.507059e+37 }
 0x167   : > { %v2731_v58 = vpop.eup %2730  ;;  %v1249_v60 = vadd.f32 %v3677_v32, %v1248_v53  ;;  %v3725_v0 = vadd.f32 1.0, %v2729_v55  ;;  %v2466_v5 = vmul.f32 -1.442695, %v975_v54  ;;  %v2418_v9 = vmul.f32 -1.442695, %v927_v57 }
 0x168   : > { %v1489_v1 = vadd.f32 %v3684_v35, %v1488_v56  ;;  %v1726_v3 = vmul.f32 %v2731_v58, %v3673_v27  ;;  %v2733_v6 = vpop.eup %2732  ;;  %vm1731_vm12 = vweird.f32 %v2731_v58  ;;  %v2449_v30 = vmul.f32 -1.442695, %v958_v11 }
 0x169   : > { %v1253_v7 = vsel %vm1252_vm8, %v3677_v32, %v1249_v60  ;;  %2738 = vrcp.f32 %v3725_v0  ;;  %853 = vadd.xlane.f32.xlu2 %v3666_v21  ;;  %821 = vadd.xlane.f32.xlu1 %v744_v31  ;;  %v1966_v10 = vmul.f32 %v2733_v6, %v3680_v33  ;;  %v2735_v16 = vpop.eup %2734  ;;  %vm1971_vm13 = vweird.f32 %v2733_v6  ;;  %vm1732_vm14 = vmor %vm1730_vm7, %vm1731_vm12 }
 0x16a   : > { %v1493_v13 = vsel %vm1492_vm11, %v3684_v35, %v1489_v1  ;;  %v1258_v14 = vsel %vm3698_vm3, %v1257_v42, %v1253_v7  ;;  %v1727_v15 = vsub.f32 1.0, %v1726_v3  ;;  %885 = vadd.xlane.f32.xlu0 %v776_v34  ;;  %v2737_v21 = vpop.eup %2736  ;;  %v3762_v25 = vadd.f32 1.0, %v2735_v16  ;;  %vm1972_vm2 = vmor %vm1970_vm10, %vm1971_vm13 }
 0x16b   : > { %v1498_v17 = vsel %vm3702_vm4, %v1497_v45, %v1493_v13  ;;  %2206 = vst.msk [vmem:[%s3730_s19] sm:$0xff] %vm2205_vm0, %v1258_v14  ;;  %v1967_v23 = vsub.f32 1.0, %v1966_v10  ;;  %2740 = vpow2.f32 %v2466_v5  ;;  %v1509_v26 = vand.u32 2147483647, %v3725_v0 }
 0x16c   : > { %2222 = vst.msk [vmem:[%s3730_s19 + $0x80] sm:$0xff] %vm2205_vm0, %v1498_v17  ;;  %v1728_v22 = vmul.f32 %v2731_v58, %v1727_v15  ;;  %v3765_v28 = vadd.f32 1.0, %v2737_v21  ;;  %2742 = vpow2.f32 %v2418_v9  ;;  %v1977_v34 = vor.u32 1.1754944e-38, %v1976_v19  ;;  %v866_v55 = vpop.xlane.xlu2 %865 }
 0x16d   : > { %v1968_v24 = vmul.f32 %v2733_v6, %v1967_v23  ;;  %2744 = vrcp.f32 %v3762_v25  ;;  %v1511_v35 = vand.u32 2147483648, %v3725_v0  ;;  %vm1505_vm1 = vweird.f32 %v3725_v0 }
 0x16e   : > { %v1729_v29 = vadd.f32 %v2731_v58, %v1728_v22  ;;  %2746 = vrcp.f32 %v3765_v28  ;;  %vm3784_vm3 = vcmp.eq.f32.partialorder %v1509_v26, 8.507059e+37  ;;  %v1989_v20 = vand.u32 2147483647, %v3762_v25 }
 0x16f   : > { %v2739_v31 = vpop.eup %2738  ;;  %v1969_v37 = vadd.f32 %v2733_v6, %v1968_v24  ;;  %v1991_v41 = vand.u32 2147483648, %v3762_v25  ;;  %v1269_v45 = vand.u32 2147483647, %v3765_v28  ;;  %2748 = vpow2.f32 %v2449_v30 }
 0x170   : > { %v1733_v36 = vsel %vm1732_vm14, %v2731_v58, %v1729_v29  ;;  %v1501_v39 = vmul.f32 %v2739_v31, %v3725_v0  ;;  %v1512_v47 = vor.u32 1.1754944e-38, %v1511_v35  ;;  %v1271_v48 = vand.u32 2147483648, %v3765_v28  ;;  %v864_v58 = vpop.xlane.xlu1 %863 }
 0x171   : > { %v1738_v27 = vsel %vm3738_vm9, %v1737_v18, %v1733_v36  ;;  %v2741_v42 = vpop.eup %2740  ;;  %v1973_v43 = vsel %vm1972_vm2, %v2733_v6, %v1969_v37  ;;  %vm1506_vm4 = vweird.f32 %v2739_v31  ;;  %vm1985_vm5 = vweird.f32 %v3762_v25  ;;  %v832_v18 = vpop.xlane.xlu0 %831 }
 0x172   : > { %2238 = vst.msk [vmem:[%s3730_s19 + $0x100] sm:$0xff] %vm2205_vm0, %v1738_v27  ;;  %v1502_v44 = vsub.f32 1.0, %v1501_v39  ;;  %v2743_v46 = vpop.eup %2742  ;;  %v1978_v33 = vsel %vm3771_vm15, %v1977_v34, %v1973_v43  ;;  %v3796_v49 = vadd.f32 1.0, %v2741_v42  ;;  %vm3804_vm6 = vcmp.eq.f32.partialorder %v1989_v20, 8.507059e+37  ;;  %vm1507_vm9 = vmor %vm1505_vm1, %vm1506_vm4  ;;  %v593_v39 = vpop.f32.mrf.mxu3 }
 0x173   : > { %v2745_v50 = vpop.eup %2744  ;;  %2254 = vst.msk [vmem:[%s3730_s19 + $0x180] sm:$0xff] %vm2205_vm0, %v1978_v33  ;;  %v3801_v54 = vadd.f32 1.0, %v2743_v46  ;;  %vm1265_vm7 = vweird.f32 %v3765_v28  ;;  %v1992_v61 = vor.u32 1.1754944e-38, %v1991_v41  ;;  %vm3811_vm8 = vcmp.eq.f32.partialorder %v1269_v45, 8.507059e+37  ;;  %v3875_v33 = vld [vmem:[%s4925_s3] ss:$0 sm:$0xff] }
 0x174   : > { %v1503_v53 = vmul.f32 %v2739_v31, %v1502_v44  ;;  %v2747_v56 = vpop.eup %2746  ;;  %v1981_v57 = vmul.f32 %v2745_v50, %v3762_v25  ;;  %2750 = vrcp.f32 %v3796_v49  ;;  %v1272_v4 = vor.u32 1.1754944e-38, %v1271_v48  ;;  %v3868_v44 = vld [vmem:[%s4924_s2] ss:$0 sm:$0xff] }
 0x175   : > { %v1261_v63 = vmul.f32 %v2747_v56, %v3765_v28  ;;  %2752 = vrcp.f32 %v3801_v54  ;;  %v960_v5 = vadd.f32 %v3595_v38, %v866_v55  ;;  %v2749_v6 = vpop.eup %2748  ;;  %vm1986_vm10 = vweird.f32 %v2745_v50  ;;  %v452_v28 = vpop.f32.mrf.mxu0 }
 0x176   : > { %v1504_v60 = vadd.f32 %v2739_v31, %v1503_v53  ;;  %v1982_v3 = vsub.f32 1.0, %v1981_v57  ;;  %v959_v11 = vadd.f32 %v3595_v38, %v864_v58  ;;  %v2004_v15 = vand.u32 2147483647, %v3796_v49  ;;  %vm1987_vm13 = vmor %vm1985_vm5, %vm1986_vm10 }
 0x177   : > { %v1262_v9 = vsub.f32 1.0, %v1261_v63  ;;  %v2006_v0 = vand.u32 2147483648, %v3796_v49  ;;  %vm1266_vm11 = vweird.f32 %v2747_v56  ;;  %v1284_v16 = vand.u32 2147483647, %v3801_v54 }
 0x178   : > { %v1508_v7 = vsel %vm1507_vm9, %v2739_v31, %v1504_v60  ;;  %v1983_v14 = vmul.f32 %v2745_v50, %v1982_v3  ;;  %v3827_v17 = vadd.f32 1.0, %v2749_v6  ;;  %vm2000_vm12 = vweird.f32 %v3796_v49  ;;  %vm1267_vm15 = vmor %vm1265_vm7, %vm1266_vm11  ;;  %v802_v58 = vpop.xlane.xlu1 %801 }
 0x179   : > { %v1513_v13 = vsel %vm3784_vm3, %v1512_v47, %v1508_v7  ;;  %v1263_v10 = vmul.f32 %v2747_v56, %v1262_v9  ;;  %v1286_v22 = vand.u32 2147483648, %v3801_v54  ;;  %2754 = vtanh.f32 %v3709_v51 }
 0x17a   : > { %2223 = vst.msk [vmem:[%s3730_s19 + $0x88] sm:$0xff] %vm2205_vm0, %v1513_v13  ;;  %v2751_v19 = vpop.eup %2750  ;;  %v1984_v21 = vadd.f32 %v2745_v50, %v1983_v14  ;;  %vm1280_vm14 = vweird.f32 %v3801_v54  ;;  %2756 = vrcp.f32 %v3827_v17  ;;  %v2451_v29 = vmul.f32 -1.442695, %v960_v5 }
 0x17b   : > { %v1264_v23 = vadd.f32 %v2747_v56, %v1263_v10  ;;  %v1996_v26 = vmul.f32 %v2751_v19, %v3796_v49  ;;  %v3838_v24 = vpop.eup %2752  ;;  %vm3843_vm1 = vcmp.eq.f32.partialorder %v2004_v15, 8.507059e+37  ;;  %v2007_v25 = vor.u32 1.1754944e-38, %v2006_v0  ;;  %v898_v49 = vpop.xlane.xlu0 %897 }
 0x17c   : > { %v1988_v30 = vsel %vm1987_vm13, %v2745_v50, %v1984_v21  ;;  %v2450_v31 = vmul.f32 -1.442695, %v959_v11  ;;  %v1276_v36 = vmul.f32 %v3838_v24, %v3801_v54  ;;  %vm3851_vm2 = vcmp.eq.f32.partialorder %v1284_v16, 8.507059e+37  ;;  %v596_v16 = vpop.f32.mrf.mxu3 }
 0x17d   : > { %v1993_v32 = vsel %vm3804_vm6, %v1992_v61, %v1988_v30  ;;  %v1268_v34 = vsel %vm1267_vm15, %v2747_v56, %v1264_v23  ;;  %v1997_v35 = vsub.f32 1.0, %v1996_v26  ;;  %vm2001_vm3 = vweird.f32 %v2751_v19  ;;  %v804_v56 = vpop.xlane.xlu2 %803 }
 0x17e   : > { %2255 = vst.msk [vmem:[%s3730_s19 + $0x188] sm:$0xff] %vm2205_vm0, %v1993_v32  ;;  %v1273_v27 = vsel %vm3811_vm8, %v1272_v4, %v1268_v34  ;;  %vm1281_vm4 = vweird.f32 %v3838_v24  ;;  %v1287_v40 = vor.u32 1.1754944e-38, %v1286_v22  ;;  %v1277_v41 = vsub.f32 1.0, %v1276_v36  ;;  %vm2002_vm5 = vmor %vm2000_vm12, %vm2001_vm3 }
 0x17f   : > { %2207 = vst.msk [vmem:[%s3730_s19 + $0x8] sm:$0xff] %vm2205_vm0, %v1273_v27  ;;  %v1998_v20 = vmul.f32 %v2751_v19, %v1997_v35  ;;  %2758 = vpow2.f32 %v2451_v29  ;;  %v943_v42 = vadd.f32 %v3595_v38, %v832_v18  ;;  %v3863_v43 = vpop.eup %2754  ;;  %v453_v45 = vadd.f32 %v3868_v44, %v452_v28  ;;  %vm1282_vm6 = vmor %vm1280_vm14, %vm1281_vm4 }
 0x180   : > { %2760 = vpow2.f32 %v2450_v31  ;;  %v594_v46 = vadd.f32 %v3868_v44, %v593_v39  ;;  %v745_v47 = vmul.f32 %v3875_v33, %v3619_v59  ;;  %v2757_v48 = vpop.eup %2756  ;;  %v1278_v53 = vmul.f32 %v3838_v24, %v1277_v41  ;;  %694 = vst [vmem:[%s3356_s10 + $0xf8] sm:$0xff] %v3863_v43  ;;  %v834_v31 = vpop.xlane.xlu1 %833 }
 0x181   : > { %v1999_v50 = vadd.f32 %v2751_v19, %v1998_v20  ;;  %2762 = vtanh.f32 %v3712_v52  ;;  %v2434_v55 = vmul.f32 -1.442695, %v943_v42  ;;  %v1741_v57 = vmul.f32 %v2757_v48, %v3827_v17 }
 0x182   : > { %v1749_v12 = vand.u32 2147483647, %v3827_v17  ;;  %2764 = vtanh.f32 %v453_v45  ;;  %823 = vadd.xlane.f32.xlu2 %v745_v47  ;;  %v777_v59 = vmul.f32 %v3875_v33, %v3622_v62  ;;  %v1279_v52 = vadd.f32 %v3838_v24, %v1278_v53 }
 0x183   : > { %v2003_v60 = vsel %vm2002_vm5, %v2751_v19, %v1999_v50  ;;  %2766 = vpow2.f32 %v2434_v55  ;;  %v761_v61 = vmul.f32 %v3875_v33, %v3631_v2  ;;  %v1742_v1 = vsub.f32 1.0, %v1741_v57  ;;  %v868_v53 = vpop.xlane.xlu0 %867 }
 0x184   : > { %v2008_v63 = vsel %vm3843_vm1, %v2007_v25, %v2003_v60  ;;  %2768 = vtanh.f32 %v594_v46  ;;  %887 = vadd.xlane.f32.xlu1 %v777_v59  ;;  %v929_v62 = vadd.f32 %v3595_v38, %v804_v56  ;;  %v1283_v2 = vsel %vm1282_vm6, %v3838_v24, %v1279_v52 }
 0x185   : > { %v2759_v3 = vpop.eup %2758  ;;  %2256 = vst.msk [vmem:[%s3730_s19 + $0x190] sm:$0xff] %vm2205_vm0, %v2008_v63  ;;  %vm1746_vm7 = vweird.f32 %v2757_v48  ;;  %v1751_v4 = vand.u32 2147483648, %v3827_v17  ;;  %855 = vadd.xlane.f32.xlu0 %v761_v61  ;;  %v928_v5 = vadd.f32 %v3595_v38, %v802_v58  ;;  %v1288_v6 = vsel %vm3851_vm2, %v1287_v40, %v1283_v2  ;;  %v836_v51 = vpop.xlane.xlu2 %835 }
 0x186   : > { %v2761_v54 = vpop.eup %2760  ;;  %v1743_v7 = vmul.f32 %v2757_v48, %v1742_v1  ;;  %v3907_v9 = vadd.f32 1.0, %v2759_v3  ;;  %v976_v11 = vadd.f32 %v3595_v38, %v898_v49  ;;  %2208 = vst.msk [vmem:[%s3730_s19 + $0x10] sm:$0xff] %vm2205_vm0, %v1288_v6  ;;  %v2420_v15 = vmul.f32 -1.442695, %v929_v62 }
 0x187   : > { %v2763_v13 = vpop.eup %2762  ;;  %v3912_v14 = vadd.f32 1.0, %v2761_v54  ;;  %vm1745_vm8 = vweird.f32 %v3827_v17  ;;  %v1752_v19 = vor.u32 1.1754944e-38, %v1751_v4  ;;  %v2419_v21 = vmul.f32 -1.442695, %v928_v5 }
 0x188   : > { %v2765_v0 = vpop.eup %2764  ;;  %v1744_v10 = vadd.f32 %v2757_v48, %v1743_v7  ;;  %2770 = vrcp.f32 %v3907_v9  ;;  %710 = vst [vmem:[%s3356_s10 + $0x178] sm:$0xff] %v2763_v13  ;;  %vm1747_vm9 = vmor %vm1745_vm8, %vm1746_vm7  ;;  %vm1750_vm10 = vcmp.eq.f32.partialorder %v1749_v12, 8.507059e+37  ;;  %v2467_v17 = vmul.f32 -1.442695, %v976_v11  ;;  %v3965_v7 = vpop.xlane.xlu1 %899 }
 0x189   : > { %v2767_v18 = vpop.eup %2766  ;;  %2772 = vrcp.f32 %v3912_v14  ;;  %678 = vst [vmem:[%s3356_s10 + $0x78] sm:$0xff] %v2765_v0  ;;  %v1779_v24 = vand.u32 2147483647, %v3907_v9  ;;  %v597_v30 = vadd.f32 %v3868_v44, %v596_v16  ;;  %v1781_v25 = vand.u32 2147483648, %v3907_v9 }
 0x18a   : > { %v2769_v22 = vpop.eup %2768  ;;  %v1748_v23 = vsel %vm1747_vm9, %v2757_v48, %v1744_v10  ;;  %v3920_v26 = vadd.f32 1.0, %v2767_v18  ;;  %2774 = vpow2.f32 %v2420_v15  ;;  %vm1775_vm11 = vweird.f32 %v3907_v9 }
 0x18b   : > { %v1753_v29 = vsel %vm1750_vm10, %v1752_v19, %v1748_v23  ;;  %725 = vst [vmem:[%s3356_s10 + $0x1f0] sm:$0xff] %v2769_v22  ;;  %v1766_v32 = vand.u32 2147483648, %v3912_v14  ;;  %v778_v34 = vmul.f32 %v3875_v33, %v2763_v13  ;;  %v762_v35 = vmul.f32 %v3875_v33, %v3863_v43 }
 0x18c   : > { %2239 = vst.msk [vmem:[%s3730_s19 + $0x108] sm:$0xff] %vm2205_vm0, %v1753_v29  ;;  %2776 = vrcp.f32 %v3920_v26  ;;  %vm1760_vm12 = vweird.f32 %v3912_v14  ;;  %v746_v37 = vmul.f32 %v3875_v33, %v2765_v0  ;;  %v945_v28 = vadd.f32 %v3595_v38, %v836_v51 }
 0x18d   : > { %2778 = vpow2.f32 %v2419_v21  ;;  %vm3938_vm13 = vcmp.eq.f32.partialorder %v1779_v24, 8.507059e+37  ;;  %v1764_v20 = vand.u32 2147483647, %v3912_v14  ;;  %889 = vadd.xlane.f32.xlu2 %v778_v34  ;;  %857 = vadd.xlane.f32.xlu1 %v762_v35  ;;  %v1782_v41 = vor.u32 1.1754944e-38, %v1781_v25  ;;  %v3957_v5 = vpop.xlane.xlu2 %805 }
 0x18e   : > { %v2771_v36 = vpop.eup %2770  ;;  %2780 = vpow2.f32 %v2467_v17  ;;  %825 = vadd.xlane.f32.xlu0 %v746_v37  ;;  %v2436_v43 = vmul.f32 -1.442695, %v945_v28  ;;  %v944_v44 = vadd.f32 %v3595_v38, %v834_v31  ;;  %v1767_v47 = vor.u32 1.1754944e-38, %v1766_v32 }
 0x18f   : > { %v2773_v39 = vpop.eup %2772  ;;  %v1771_v27 = vmul.f32 %v2771_v36, %v3907_v9  ;;  %2782 = vtanh.f32 %v597_v30  ;;  %v1524_v48 = vand.u32 2147483647, %v3920_v26  ;;  %v1526_v50 = vand.u32 2147483648, %v3920_v26 }
 0x190   : > { %v1756_v42 = vmul.f32 %v2773_v39, %v3912_v14  ;;  %v2775_v45 = vpop.eup %2774  ;;  %vm1776_vm14 = vweird.f32 %v2771_v36  ;;  %v2435_v12 = vmul.f32 -1.442695, %v944_v44  ;;  %vm1761_vm15 = vweird.f32 %v2773_v39  ;;  %v870_v44 = vpop.xlane.xlu1 %869 }
 0x191   : > { %v1772_v46 = vsub.f32 1.0, %v1771_v27  ;;  %v3947_v57 = vadd.f32 1.0, %v2775_v45  ;;  %2784 = vpow2.f32 %v2436_v43  ;;  %v961_v49 = vadd.f32 %v3595_v38, %v868_v53  ;;  %vm1777_vm1 = vmor %vm1775_vm11, %vm1776_vm14 }
 0x192   : > { %v2777_v55 = vpop.eup %2776  ;;  %v1757_v56 = vsub.f32 1.0, %v1756_v42  ;;  %v793_v63 = vmul.f32 %v3875_v33, %v2769_v22  ;;  %v792_v4 = vmul.f32 %v3875_v33, %v3641_v8  ;;  %vm1762_vm3 = vmor %vm1760_vm12, %vm1761_vm15  ;;  %vm1765_vm4 = vcmp.eq.f32.partialorder %v1764_v20, 8.507059e+37 }
 0x193   : > { %v2779_v59 = vpop.eup %2778  ;;  %v1773_v58 = vmul.f32 %v2771_v36, %v1772_v46  ;;  %v1516_v60 = vmul.f32 %v2777_v55, %v3920_v26  ;;  %2786 = vrcp.f32 %v3947_v57  ;;  %vm1521_vm2 = vweird.f32 %v2777_v55 }
 0x194   : > { %v2781_v52 = vpop.eup %2780  ;;  %v1758_v61 = vmul.f32 %v2773_v39, %v1757_v56  ;;  %v3953_v2 = vadd.f32 1.0, %v2779_v59  ;;  %2788 = vpow2.f32 %v2435_v12  ;;  %v1314_v13 = vand.u32 2147483647, %v3947_v57 }
 0x195   : > { %v2783_v1 = vpop.eup %2782  ;;  %v1774_v62 = vadd.f32 %v2771_v36, %v1773_v58  ;;  %v1517_v3 = vsub.f32 1.0, %v1516_v60  ;;  %v3962_v6 = vadd.f32 1.0, %v2781_v52  ;;  %919 = vadd.xlane.f32.xlu2 %v793_v63  ;;  %917 = vadd.xlane.f32.xlu1 %v792_v4  ;;  %vm1520_vm5 = vweird.f32 %v3920_v26 }
 0x196   : > { %v1759_v54 = vadd.f32 %v2773_v39, %v1758_v61  ;;  %726 = vst [vmem:[%s3356_s10 + $0x1f8] sm:$0xff] %v2783_v1  ;;  %2790 = vrcp.f32 %v3953_v2  ;;  %v2452_v16 = vmul.f32 -1.442695, %v961_v49  ;;  %vm1522_vm6 = vmor %vm1520_vm5, %vm1521_vm2  ;;  %vm1525_vm7 = vcmp.eq.f32.partialorder %v1524_v48, 8.507059e+37  ;;  %s2276_s10 = scalar_lea.sflag [#allocation5], %s3258_s8 }
 0x197   : > { %v1778_v11 = vsel %vm1777_vm1, %v2771_v36, %v1774_v62  ;;  %v1518_v8 = vmul.f32 %v2777_v55, %v1517_v3  ;;  %v2785_v0 = vpop.eup %2784  ;;  %2792 = vrcp.f32 %v3962_v6  ;;  %v1527_v19 = vor.u32 1.1754944e-38, %v1526_v50 }
 0x198   : > { %v1783_v9 = vsel %vm3938_vm13, %v1782_v41, %v1778_v11  ;;  %v1763_v15 = vsel %vm1762_vm3, %v2773_v39, %v1759_v54  ;;  %vm1310_vm8 = vweird.f32 %v3947_v57  ;;  %v1316_v21 = vand.u32 2147483648, %v3947_v57  ;;  %v838_v39 = vpop.xlane.xlu0 %837  ;;  %v902_v41 = vpop.xlane.xlu2 %901 }
 0x199   : > { %2241 = vst.msk [vmem:[%s3730_s19 + $0x118] sm:$0xff] %vm2205_vm0, %v1783_v9  ;;  %v1768_v14 = vsel %vm1765_vm4, %v1767_v47, %v1763_v15  ;;  %v1519_v10 = vadd.f32 %v2777_v55, %v1518_v8  ;;  %v2787_v18 = vpop.eup %2786  ;;  %vm3984_vm9 = vcmp.eq.f32.partialorder %v1314_v13, 8.507059e+37  ;;  %v1299_v17 = vand.u32 2147483647, %v3953_v2 }
 0x19a   : > { %2240 = vst.msk [vmem:[%s3730_s19 + $0x110] sm:$0xff] %vm2205_vm0, %v1768_v14  ;;  %v1306_v23 = vmul.f32 %v2787_v18, %v3947_v57  ;;  %v1301_v29 = vand.u32 2147483648, %v3953_v2  ;;  %v2789_v24 = vpop.eup %2788  ;;  %v2019_v51 = vand.u32 2147483647, %v3962_v6  ;;  %v2021_v25 = vand.u32 2147483648, %v3962_v6 }
 0x19b   : > { %v1523_v22 = vsel %vm1522_vm6, %v2777_v55, %v1519_v10  ;;  %v3992_v31 = vadd.f32 1.0, %v2785_v0  ;;  %v3996_v35 = vadd.f32 1.0, %v2789_v24  ;;  %2794 = vpow2.f32 %v2452_v16 }
 0x19c   : > { %v1528_v30 = vsel %vm1525_vm7, %v1527_v19, %v1523_v22  ;;  %v2791_v32 = vpop.eup %2790  ;;  %v1307_v34 = vsub.f32 1.0, %v1306_v23  ;;  %v794_v36 = vmul.f32 %v3875_v33, %v2783_v1  ;;  %v1317_v37 = vor.u32 1.1754944e-38, %v1316_v21  ;;  %v840_v22 = vpop.xlane.xlu1 %839 }
 0x19d   : > { %2224 = vst.msk [vmem:[%s3730_s19 + $0x90] sm:$0xff] %vm2205_vm0, %v1528_v30  ;;  %v1291_v28 = vmul.f32 %v2791_v32, %v3953_v2  ;;  %vm1295_vm10 = vweird.f32 %v3953_v2  ;;  %2796 = vrcp.f32 %v3992_v31  ;;  %v2793_v27 = vpop.eup %2792  ;;  %vm1311_vm11 = vweird.f32 %v2787_v18 }
 0x19e   : > { %v1308_v40 = vmul.f32 %v2787_v18, %v1307_v34  ;;  %vm4002_vm12 = vcmp.eq.f32.partialorder %v1299_v17, 8.507059e+37  ;;  %2798 = vrcp.f32 %v3996_v35  ;;  %921 = vadd.xlane.f32.xlu0 %v794_v36  ;;  %v1302_v42 = vor.u32 1.1754944e-38, %v1301_v29  ;;  %vm1312_vm15 = vmor %vm1310_vm8, %vm1311_vm11 }
 0x19f   : > { %v1292_v33 = vsub.f32 1.0, %v1291_v28  ;;  %v2011_v43 = vmul.f32 %v2793_v27, %v3962_v6  ;;  %vm2015_vm13 = vweird.f32 %v3962_v6  ;;  %vm4009_vm14 = vcmp.eq.f32.partialorder %v2019_v51, 8.507059e+37 }
 0x1a0   : > { %v1309_v45 = vadd.f32 %v2787_v18, %v1308_v40  ;;  %v2022_v47 = vor.u32 1.1754944e-38, %v2021_v25  ;;  %v1554_v48 = vand.u32 2147483647, %v3992_v31  ;;  %vm1296_vm1 = vweird.f32 %v2791_v32  ;;  %v808_v0 = vpop.xlane.xlu0 %807  ;;  %v872_v16 = vpop.xlane.xlu2 %871 }
 0x1a1   : > { %v1293_v50 = vmul.f32 %v2791_v32, %v1292_v33  ;;  %v2012_v53 = vsub.f32 1.0, %v2011_v43  ;;  %v930_v55 = vadd.f32 %v3595_v38, %v3957_v5  ;;  %v2795_v56 = vpop.eup %2794  ;;  %vm2016_vm2 = vweird.f32 %v2793_v27  ;;  %vm1297_vm5 = vmor %vm1295_vm10, %vm1296_vm1 }
 0x1a2   : > { %v1313_v12 = vsel %vm1312_vm15, %v2787_v18, %v1309_v45  ;;  %vm1550_vm3 = vweird.f32 %v3992_v31  ;;  %v1556_v59 = vand.u32 2147483648, %v3992_v31  ;;  %vm1535_vm4 = vweird.f32 %v3996_v35  ;;  %vm2017_vm7 = vmor %vm2015_vm13, %vm2016_vm2 }
 0x1a3   : > { %v2797_v58 = vpop.eup %2796  ;;  %v1318_v60 = vsel %vm3984_vm9, %v1317_v37, %v1313_v12  ;;  %v1294_v57 = vadd.f32 %v2791_v32, %v1293_v50  ;;  %v2013_v52 = vmul.f32 %v2793_v27, %v2012_v53  ;;  %vm4029_vm6 = vcmp.eq.f32.partialorder %v1554_v48, 8.507059e+37 }
 0x1a4   : > { %v2799_v61 = vpop.eup %2798  ;;  %2210 = vst.msk [vmem:[%s3730_s19 + $0x20] sm:$0xff] %vm2205_vm0, %v1318_v60  ;;  %v1546_v49 = vmul.f32 %v2797_v58, %v3992_v31  ;;  %v4033_v1 = vadd.f32 1.0, %v2795_v56  ;;  %v2421_v62 = vmul.f32 -1.442695, %v930_v55  ;;  %v977_v3 = vadd.f32 %v3595_v38, %v3965_v7  ;;  %v810_v12 = vpop.xlane.xlu1 %809 }
 0x1a5   : > { %v1298_v4 = vsel %vm1297_vm5, %v2791_v32, %v1294_v57  ;;  %v2014_v5 = vadd.f32 %v2793_v27, %v2013_v52  ;;  %v1531_v54 = vmul.f32 %v2799_v61, %v3996_v35  ;;  %v946_v2 = vadd.f32 %v3595_v38, %v838_v39 }
 0x1a6   : > { %v1303_v11 = vsel %vm4002_vm12, %v1302_v42, %v1298_v4  ;;  %v1547_v8 = vsub.f32 1.0, %v1546_v49  ;;  %v1539_v13 = vand.u32 2147483647, %v3996_v35  ;;  %2800 = vrcp.f32 %v4033_v1 }
 0x1a7   : > { %2209 = vst.msk [vmem:[%s3730_s19 + $0x18] sm:$0xff] %vm2205_vm0, %v1303_v11  ;;  %v2018_v7 = vsel %vm2017_vm7, %v2793_v27, %v2014_v5  ;;  %vm1551_vm8 = vweird.f32 %v2797_v58  ;;  %v1532_v9 = vsub.f32 1.0, %v1531_v54  ;;  %v1541_v15 = vand.u32 2147483648, %v3996_v35 }
 0x1a8   : > { %v2023_v14 = vsel %vm4009_vm14, %v2022_v47, %v2018_v7  ;;  %v1548_v10 = vmul.f32 %v2797_v58, %v1547_v8  ;;  %2802 = vpow2.f32 %v2421_v62  ;;  %v2468_v6 = vmul.f32 -1.442695, %v977_v3  ;;  %vm1552_vm10 = vmor %vm1550_vm3, %vm1551_vm8  ;;  %v904_v46 = vpop.xlane.xlu0 %903  ;;  %v842_v53 = vpop.xlane.xlu2 %841 }
 0x1a9   : > { %2257 = vst.msk [vmem:[%s3730_s19 + $0x198] sm:$0xff] %vm2205_vm0, %v2023_v14  ;;  %v1557_v18 = vor.u32 1.1754944e-38, %v1556_v59  ;;  %v1533_v19 = vmul.f32 %v2799_v61, %v1532_v9  ;;  %vm1536_vm9 = vweird.f32 %v2799_v61  ;;  %v2437_v21 = vmul.f32 -1.442695, %v946_v2 }
 0x1aa   : > { %v1549_v23 = vadd.f32 %v2797_v58, %v1548_v10  ;;  %2804 = vpow2.f32 %v2468_v6  ;;  %v978_v26 = vadd.f32 %v3595_v38, %v902_v41  ;;  %v962_v17 = vadd.f32 %v3595_v38, %v870_v44  ;;  %vm1537_vm12 = vmor %vm1535_vm4, %vm1536_vm9 }
 0x1ab   : > { %v1534_v29 = vadd.f32 %v2799_v61, %v1533_v19  ;;  %vm1540_vm11 = vcmp.eq.f32.partialorder %v1539_v13, 8.507059e+37  ;;  %2806 = vpow2.f32 %v2437_v21  ;;  %v931_v24 = vadd.f32 %v3595_v38, %v808_v0 }
 0x1ac   : > { %v2801_v30 = vpop.eup %2800  ;;  %v1553_v51 = vsel %vm1552_vm10, %v2797_v58, %v1549_v23  ;;  %v1542_v25 = vor.u32 1.1754944e-38, %v1541_v15  ;;  %v2469_v32 = vmul.f32 -1.442695, %v978_v26  ;;  %v2453_v34 = vmul.f32 -1.442695, %v962_v17 }
 0x1ad   : > { %v1558_v36 = vsel %vm4029_vm6, %v1557_v18, %v1553_v51  ;;  %v1538_v31 = vsel %vm1537_vm12, %v2799_v61, %v1534_v29  ;;  %v1786_v37 = vmul.f32 %v2801_v30, %v4033_v1  ;;  %v1794_v28 = vand.u32 2147483647, %v4033_v1 }
 0x1ae   : > { %v2803_v39 = vpop.eup %2802  ;;  %2226 = vst.msk [vmem:[%s3730_s19 + $0xa0] sm:$0xff] %vm2205_vm0, %v1558_v36  ;;  %v1543_v27 = vsel %vm1540_vm11, %v1542_v25, %v1538_v31  ;;  %2808 = vpow2.f32 %v2469_v32  ;;  %v2422_v40 = vmul.f32 -1.442695, %v931_v24  ;;  %v963_v35 = vadd.f32 %v3595_v38, %v872_v16 }
 0x1af   : > { %2225 = vst.msk [vmem:[%s3730_s19 + $0x98] sm:$0xff] %vm2205_vm0, %v1543_v27  ;;  %v1787_v20 = vsub.f32 1.0, %v1786_v37  ;;  %v1796_v41 = vand.u32 2147483648, %v4033_v1  ;;  %v4071_v33 = vadd.f32 1.0, %v2803_v39  ;;  %2810 = vpow2.f32 %v2453_v34 }
 0x1b0   : > { %v2805_v42 = vpop.eup %2804  ;;  %2812 = vpow2.f32 %v2422_v40  ;;  %v947_v43 = vadd.f32 %v3595_v38, %v840_v22  ;;  %vm1791_vm13 = vweird.f32 %v2801_v30  ;;  %v2454_v50 = vmul.f32 -1.442695, %v963_v35 }
 0x1b1   : > { %v2807_v44 = vpop.eup %2806  ;;  %v1788_v45 = vmul.f32 %v2801_v30, %v1787_v20  ;;  %2814 = vrcp.f32 %v4071_v33  ;;  %v4075_v47 = vadd.f32 1.0, %v2805_v42  ;;  %vm1790_vm14 = vweird.f32 %v4033_v1 }
 0x1b2   : > { %v4077_v48 = vadd.f32 1.0, %v2807_v44  ;;  %vm1795_vm15 = vcmp.eq.f32.partialorder %v1794_v28, 8.507059e+37  ;;  %v1797_v56 = vor.u32 1.1754944e-38, %v1796_v41  ;;  %vm1792_vm1 = vmor %vm1790_vm14, %vm1791_vm13  ;;  %v1329_v58 = vand.u32 2147483647, %v4071_v33 }
 0x1b3   : > { %v1789_v55 = vadd.f32 %v2801_v30, %v1788_v45  ;;  %2816 = vrcp.f32 %v4075_v47  ;;  %v2438_v60 = vmul.f32 -1.442695, %v947_v43  ;;  %v979_v57 = vadd.f32 %v3595_v38, %v904_v46 }
 0x1b4   : > { %v2809_v59 = vpop.eup %2808  ;;  %v1331_v49 = vand.u32 2147483648, %v4071_v33  ;;  %2818 = vrcp.f32 %v4077_v48  ;;  %v4086_v63 = vadd.f32 %v3595_v38, %v842_v53  ;;  %vm1325_vm2 = vweird.f32 %v4071_v33 }
 0x1b5   : > { %v2811_v52 = vpop.eup %2810  ;;  %v1793_v61 = vsel %vm1792_vm1, %v2801_v30, %v1789_v55  ;;  %2820 = vpow2.f32 %v2454_v50  ;;  %v4090_v3 = vadd.f32 %v3595_v38, %v810_v12  ;;  %v2034_v5 = vand.u32 2147483647, %v4075_v47  ;;  %v874_v12 = vpop.xlane.xlu0 %873 }
 0x1b6   : > { %v2813_v1 = vpop.eup %2812  ;;  %v1798_v62 = vsel %vm1795_vm15, %v1797_v56, %v1793_v61  ;;  %v2036_v54 = vand.u32 2147483648, %v4075_v47  ;;  %v4096_v2 = vadd.f32 1.0, %v2809_v59  ;;  %v4098_v11 = vadd.f32 1.0, %v2811_v52 }
 0x1b7   : > { %v2815_v4 = vpop.eup %2814  ;;  %2242 = vst.msk [vmem:[%s3730_s19 + $0x120] sm:$0xff] %vm2205_vm0, %v1798_v62  ;;  %vm4101_vm3 = vcmp.eq.f32.partialorder %v1329_v58, 8.507059e+37  ;;  %v1569_v7 = vand.u32 2147483647, %v4077_v48  ;;  %2822 = vpow2.f32 %v2438_v60  ;;  %v4106_v9 = vmul.f32 -1.442695, %v979_v57 }
 0x1b8   : > { %v1321_v8 = vmul.f32 %v2815_v4, %v4071_v33  ;;  %v1332_v15 = vor.u32 1.1754944e-38, %v1331_v49  ;;  %v1571_v0 = vand.u32 2147483648, %v4077_v48  ;;  %2824 = vrcp.f32 %v4096_v2  ;;  %v812_v49 = vpop.xlane.xlu2 %811 }
 0x1b9   : > { %v4110_v14 = vadd.f32 1.0, %v2813_v1  ;;  %v2817_v10 = vpop.eup %2816  ;;  %vm2030_vm4 = vweird.f32 %v4075_v47  ;;  %vm1565_vm5 = vweird.f32 %v4077_v48  ;;  %2826 = vrcp.f32 %v4098_v11 }
 0x1ba   : > { %v1322_v6 = vsub.f32 1.0, %v1321_v8  ;;  %v2819_v16 = vpop.eup %2818  ;;  %vm1326_vm6 = vweird.f32 %v2815_v4  ;;  %v2026_v18 = vmul.f32 %v2817_v10, %v4075_v47  ;;  %vm4116_vm7 = vcmp.eq.f32.partialorder %v2034_v5, 8.507059e+37 }
 0x1bb   : > { %v2037_v21 = vor.u32 1.1754944e-38, %v2036_v54  ;;  %v2051_v22 = vand.u32 2147483648, %v4096_v2  ;;  %v2821_v23 = vpop.eup %2820  ;;  %v1561_v17 = vmul.f32 %v2819_v16, %v4077_v48  ;;  %vm4122_vm8 = vcmp.eq.f32.partialorder %v1569_v7, 8.507059e+37  ;;  %vm1327_vm11 = vmor %vm1325_vm2, %vm1326_vm6 }
 0x1bc   : > { %v1323_v26 = vmul.f32 %v2815_v4, %v1322_v6  ;;  %v2049_v24 = vand.u32 2147483647, %v4096_v2  ;;  %v2027_v30 = vsub.f32 1.0, %v2026_v18  ;;  %v1572_v51 = vor.u32 1.1754944e-38, %v1571_v0  ;;  %v906_v18 = vpop.xlane.xlu1 %905 }
 0x1bd   : > { %v1809_v25 = vand.u32 2147483647, %v4098_v11  ;;  %2828 = vrcp.f32 %v4110_v14  ;;  %v2823_v32 = vpop.eup %2822  ;;  %vm2031_vm9 = vweird.f32 %v2817_v10  ;;  %v1562_v36 = vsub.f32 1.0, %v1561_v17 }
 0x1be   : > { %v1324_v34 = vadd.f32 %v2815_v4, %v1323_v26  ;;  %vm2045_vm10 = vweird.f32 %v4096_v2  ;;  %v2825_v31 = vpop.eup %2824  ;;  %v2028_v37 = vmul.f32 %v2817_v10, %v2027_v30  ;;  %vm1566_vm12 = vweird.f32 %v2819_v16  ;;  %vm2032_vm1 = vmor %vm2030_vm4, %vm2031_vm9 }
 0x1bf   : > { %v2052_v28 = vor.u32 1.1754944e-38, %v2051_v22  ;;  %vm1805_vm13 = vweird.f32 %v4098_v11  ;;  %v4134_v39 = vadd.f32 1.0, %v2821_v23  ;;  %v2827_v27 = vpop.eup %2826  ;;  %v1563_v35 = vmul.f32 %v2819_v16, %v1562_v36  ;;  %vm1567_vm2 = vmor %vm1565_vm5, %vm1566_vm12 }
 0x1c0   : > { %v1328_v40 = vsel %vm1327_vm11, %v2815_v4, %v1324_v34  ;;  %v2041_v20 = vmul.f32 %v2825_v31, %v4096_v2  ;;  %vm4137_vm14 = vcmp.eq.f32.partialorder %v2049_v24, 8.507059e+37  ;;  %v1811_v33 = vand.u32 2147483648, %v4098_v11 }
 0x1c1   : > { %v1333_v42 = vsel %vm4101_vm3, %v1332_v15, %v1328_v40  ;;  %v2029_v43 = vadd.f32 %v2817_v10, %v2028_v37  ;;  %v1801_v44 = vmul.f32 %v2827_v27, %v4098_v11  ;;  %vm4145_vm15 = vcmp.eq.f32.partialorder %v1809_v25, 8.507059e+37 }
 0x1c2   : > { %v1344_v46 = vand.u32 2147483647, %v4110_v14  ;;  %2211 = vst.msk [vmem:[%s3730_s19 + $0x28] sm:$0xff] %vm2205_vm0, %v1333_v42  ;;  %v1564_v50 = vadd.f32 %v2819_v16, %v1563_v35  ;;  %v2042_v53 = vsub.f32 1.0, %v2041_v20  ;;  %v1346_v55 = vand.u32 2147483648, %v4110_v14 }
 0x1c3   : > { %v4156_v56 = vadd.f32 1.0, %v2823_v32  ;;  %v2829_v59 = vpop.eup %2828  ;;  %v2033_v58 = vsel %vm2032_vm1, %v2817_v10, %v2029_v43  ;;  %vm2046_vm3 = vweird.f32 %v2825_v31  ;;  %v1802_v60 = vsub.f32 1.0, %v1801_v44  ;;  %v844_v32 = vpop.xlane.xlu0 %843 }
 0x1c4   : > { %2830 = vrcp.f32 %v4134_v39  ;;  %v2038_v47 = vsel %vm4116_vm7, %v2037_v21, %v2033_v58  ;;  %v1568_v57 = vsel %vm1567_vm2, %v2819_v16, %v1564_v50  ;;  %v2043_v52 = vmul.f32 %v2825_v31, %v2042_v53  ;;  %vm2047_vm6 = vmor %vm2045_vm10, %vm2046_vm3 }
 0x1c5   : > { %v1336_v61 = vmul.f32 %v2829_v59, %v4110_v14  ;;  %2258 = vst.msk [vmem:[%s3730_s19 + $0x1a0] sm:$0xff] %vm2205_vm0, %v2038_v47  ;;  %v1573_v1 = vsel %vm4122_vm8, %v1572_v51, %v1568_v57  ;;  %v1803_v62 = vmul.f32 %v2827_v27, %v1802_v60  ;;  %vm1806_vm4 = vweird.f32 %v2827_v27 }
 0x1c6   : > { %vm1340_vm5 = vweird.f32 %v4110_v14  ;;  %2227 = vst.msk [vmem:[%s3730_s19 + $0xa8] sm:$0xff] %vm2205_vm0, %v1573_v1  ;;  %v2044_v48 = vadd.f32 %v2825_v31, %v2043_v52  ;;  %v1812_v4 = vor.u32 1.1754944e-38, %v1811_v33  ;;  %2832 = vrcp.f32 %v4156_v56  ;;  %vm1807_vm8 = vmor %vm1805_vm13, %vm1806_vm4 }
 0x1c7   : > { %v1337_v5 = vsub.f32 1.0, %v1336_v61  ;;  %v1804_v54 = vadd.f32 %v2827_v27, %v1803_v62  ;;  %vm4176_vm7 = vcmp.eq.f32.partialorder %v1344_v46, 8.507059e+37  ;;  %v1347_v13 = vor.u32 1.1754944e-38, %v1346_v55 }
 0x1c8   : > { %v1826_v7 = vand.u32 2147483648, %v4134_v39  ;;  %v2048_v15 = vsel %vm2047_vm6, %v2825_v31, %v2044_v48  ;;  %vm1341_vm9 = vweird.f32 %v2829_v59  ;;  %vm1820_vm11 = vweird.f32 %v4134_v39  ;;  %v908_v31 = vpop.xlane.xlu2 %907 }
 0x1c9   : > { %v1338_v0 = vmul.f32 %v2829_v59, %v1337_v5  ;;  %v2053_v10 = vsel %vm4137_vm14, %v2052_v28, %v2048_v15  ;;  %v1808_v6 = vsel %vm1807_vm8, %v2827_v27, %v1804_v54  ;;  %v1824_v16 = vand.u32 2147483647, %v4134_v39  ;;  %vm1342_vm10 = vmor %vm1340_vm5, %vm1341_vm9 }
 0x1ca   : > { %v2831_v2 = vpop.eup %2830  ;;  %2834 = vpow2.f32 %v4106_v9  ;;  %2259 = vst.msk [vmem:[%s3730_s19 + $0x1a8] sm:$0xff] %vm2205_vm0, %v2053_v10  ;;  %v1813_v11 = vsel %vm4145_vm15, %v1812_v4, %v1808_v6  ;;  %v1584_v22 = vand.u32 2147483647, %v4156_v56  ;;  %v1827_v23 = vor.u32 1.1754944e-38, %v1826_v7 }
 0x1cb   : > { %v1339_v19 = vadd.f32 %v2829_v59, %v1338_v0  ;;  %v1816_v21 = vmul.f32 %v2831_v2, %v4134_v39  ;;  %2243 = vst.msk [vmem:[%s3730_s19 + $0x128] sm:$0xff] %vm2205_vm0, %v1813_v11  ;;  %v2439_v9 = vmul.f32 -1.442695, %v4086_v63  ;;  %v2423_v26 = vmul.f32 -1.442695, %v4090_v3 }
 0x1cc   : > { %v964_v17 = vadd.f32 %v3595_v38, %v874_v12  ;;  %v2833_v29 = vpop.eup %2832  ;;  %v933_v51 = vadd.f32 %v3595_v38, %v812_v49  ;;  %v980_v25 = vadd.f32 %v3595_v38, %v906_v18  ;;  %vm1821_vm12 = vweird.f32 %v2831_v2  ;;  %v876_v12 = vpop.xlane.xlu1 %875 }
 0x1cd   : > { %v1343_v24 = vsel %vm1342_vm10, %v2829_v59, %v1339_v19  ;;  %v1817_v30 = vsub.f32 1.0, %v1816_v21  ;;  %v1576_v34 = vmul.f32 %v2833_v29, %v4156_v56  ;;  %2836 = vpow2.f32 %v2439_v9  ;;  %vm1822_vm14 = vmor %vm1820_vm11, %vm1821_vm12 }
 0x1ce   : > { %v1348_v14 = vsel %vm4176_vm7, %v1347_v13, %v1343_v24  ;;  %2838 = vpow2.f32 %v2423_v26  ;;  %v2455_v3 = vmul.f32 -1.442695, %v964_v17  ;;  %v2424_v36 = vmul.f32 -1.442695, %v933_v51 }
 0x1cf   : > { %2212 = vst.msk [vmem:[%s3730_s19 + $0x30] sm:$0xff] %vm2205_vm0, %v1348_v14  ;;  %v1818_v63 = vmul.f32 %v2831_v2, %v1817_v30  ;;  %v1577_v28 = vsub.f32 1.0, %v1576_v34  ;;  %v1586_v27 = vand.u32 2147483648, %v4156_v56  ;;  %v2471_v40 = vmul.f32 -1.442695, %v980_v25 }
 0x1d0   : > { %v2835_v37 = vpop.eup %2834  ;;  %v949_v35 = vadd.f32 %v3595_v38, %v844_v32  ;;  %vm1581_vm13 = vweird.f32 %v2833_v29  ;;  %2840 = vpow2.f32 %v2455_v3  ;;  %v981_v43 = vadd.f32 %v3595_v38, %v908_v31 }
 0x1d1   : > { %v1819_v20 = vadd.f32 %v2831_v2, %v1818_v63  ;;  %v4210_v41 = vadd.f32 1.0, %v2835_v37  ;;  %v1578_v33 = vmul.f32 %v2833_v29, %v1577_v28  ;;  %2842 = vpow2.f32 %v2424_v36  ;;  %v814_v36 = vpop.xlane.xlu0 %813 }
 0x1d2   : > { %v2440_v42 = vmul.f32 -1.442695, %v949_v35  ;;  %vm1825_vm15 = vcmp.eq.f32.partialorder %v1824_v16, 8.507059e+37  ;;  %vm1580_vm1 = vweird.f32 %v4156_v56  ;;  %vm1585_vm3 = vcmp.eq.f32.partialorder %v1584_v22, 8.507059e+37 }
 0x1d3   : > { %v1823_v44 = vsel %vm1822_vm14, %v2831_v2, %v1819_v20  ;;  %2844 = vrcp.f32 %v4210_v41  ;;  %v2837_v45 = vpop.eup %2836  ;;  %v1579_v50 = vadd.f32 %v2833_v29, %v1578_v33  ;;  %vm1582_vm2 = vmor %vm1580_vm1, %vm1581_vm13  ;;  %v1587_v39 = vor.u32 1.1754944e-38, %v1586_v27 }
 0x1d4   : > { %v1828_v46 = vsel %vm1825_vm15, %v1827_v23, %v1823_v44  ;;  %2846 = vpow2.f32 %v2471_v40  ;;  %v2839_v53 = vpop.eup %2838  ;;  %v4221_v55 = vadd.f32 1.0, %v2837_v45  ;;  %v2472_v60 = vmul.f32 -1.442695, %v981_v43  ;;  %v878_v45 = vpop.xlane.xlu2 %877 }
 0x1d5   : > { %2244 = vst.msk [vmem:[%s3730_s19 + $0x130] sm:$0xff] %vm2205_vm0, %v1828_v46  ;;  %v1583_v59 = vsel %vm1582_vm2, %v2833_v29, %v1579_v50  ;;  %v4223_v58 = vadd.f32 1.0, %v2839_v53  ;;  %2848 = vpow2.f32 %v2440_v42  ;;  %v2064_v56 = vand.u32 2147483647, %v4210_v41 }
 0x1d6   : > { %v2841_v47 = vpop.eup %2840  ;;  %v1588_v57 = vsel %vm1585_vm3, %v1587_v39, %v1583_v59  ;;  %2850 = vrcp.f32 %v4221_v55  ;;  %v2066_v61 = vand.u32 2147483648, %v4210_v41  ;;  %v965_v49 = vadd.f32 %v3595_v38, %v876_v12  ;;  %v846_v39 = vpop.xlane.xlu1 %845 }
 0x1d7   : > { %v2843_v52 = vpop.eup %2842  ;;  %2228 = vst.msk [vmem:[%s3730_s19 + $0xb0] sm:$0xff] %vm2205_vm0, %v1588_v57  ;;  %2852 = vrcp.f32 %v4223_v58  ;;  %vm2060_vm4 = vweird.f32 %v4210_v41  ;;  %v4233_v62 = vadd.f32 1.0, %v2841_v47  ;;  %v1599_v54 = vand.u32 2147483647, %v4221_v55 }
 0x1d8   : > { %v4235_v48 = vadd.f32 1.0, %v2843_v52  ;;  %v1601_v8 = vand.u32 2147483648, %v4221_v55  ;;  %2854 = vpow2.f32 %v2472_v60  ;;  %vm4240_vm5 = vcmp.eq.f32.partialorder %v2064_v56, 8.507059e+37 }
 0x1d9   : > { %v2845_v1 = vpop.eup %2844  ;;  %v1359_v7 = vand.u32 2147483647, %v4223_v58  ;;  %v1361_v15 = vand.u32 2147483648, %v4223_v58  ;;  %2856 = vrcp.f32 %v4233_v62  ;;  %v2067_v10 = vor.u32 1.1754944e-38, %v2066_v61 }
 0x1da   : > { %v2847_v4 = vpop.eup %2846  ;;  %v2056_v5 = vmul.f32 %v2845_v1, %v4210_v41  ;;  %2858 = vrcp.f32 %v4235_v48  ;;  %v4248_v6 = vmul.f32 -1.442695, %v965_v49  ;;  %vm2061_vm6 = vweird.f32 %v2845_v1 }
 0x1db   : > { %v2849_v0 = vpop.eup %2848  ;;  %vm1595_vm7 = vweird.f32 %v4221_v55  ;;  %vm1355_vm8 = vweird.f32 %v4223_v58  ;;  %v4252_v18 = vadd.f32 1.0, %v2847_v4  ;;  %vm4255_vm9 = vcmp.eq.f32.partialorder %v1599_v54, 8.507059e+37  ;;  %vm2062_vm12 = vmor %vm2060_vm4, %vm2061_vm6 }
 0x1dc   : > { %v2057_v2 = vsub.f32 1.0, %v2056_v5  ;;  %v2851_v16 = vpop.eup %2850  ;;  %v1602_v23 = vor.u32 1.1754944e-38, %v1601_v8  ;;  %v1839_v9 = vand.u32 2147483647, %v4233_v62  ;;  %vm4261_vm11 = vcmp.eq.f32.partialorder %v1359_v7, 8.507059e+37 }
 0x1dd   : > { %v2853_v11 = vpop.eup %2852  ;;  %v1591_v21 = vmul.f32 %v2851_v16, %v4221_v55  ;;  %v1362_v29 = vor.u32 1.1754944e-38, %v1361_v15  ;;  %v1841_v24 = vand.u32 2147483648, %v4233_v62  ;;  %vm1835_vm10 = vweird.f32 %v4233_v62 }
 0x1de   : > { %v2058_v19 = vmul.f32 %v2845_v1, %v2057_v2  ;;  %v1351_v26 = vmul.f32 %v2853_v11, %v4223_v58  ;;  %v2855_v30 = vpop.eup %2854  ;;  %v1374_v32 = vand.u32 2147483647, %v4235_v48  ;;  %2860 = vrcp.f32 %v4252_v18  ;;  %v910_v2 = vpop.xlane.xlu0 %909 }
 0x1df   : > { %v1592_v25 = vsub.f32 1.0, %v1591_v21  ;;  %v2857_v14 = vpop.eup %2856  ;;  %vm1370_vm13 = vweird.f32 %v4235_v48  ;;  %v1376_v63 = vand.u32 2147483648, %v4235_v48  ;;  %v4274_v3 = vadd.f32 1.0, %v2849_v0 }
 0x1e0   : > { %v2059_v51 = vadd.f32 %v2845_v1, %v2058_v19  ;;  %v1352_v34 = vsub.f32 1.0, %v1351_v26  ;;  %v2859_v31 = vpop.eup %2858  ;;  %vm1596_vm14 = vweird.f32 %v2851_v16  ;;  %v1831_v27 = vmul.f32 %v2857_v14, %v4233_v62  ;;  %v848_v26 = vpop.xlane.xlu2 %847 }
 0x1e1   : > { %v1593_v28 = vmul.f32 %v2851_v16, %v1592_v25  ;;  %vm4277_vm15 = vcmp.eq.f32.partialorder %v1839_v9, 8.507059e+37  ;;  %vm1356_vm1 = vweird.f32 %v2853_v11  ;;  %v1366_v41 = vmul.f32 %v2859_v31, %v4235_v48  ;;  %vm1597_vm3 = vmor %vm1595_vm7, %vm1596_vm14 }
 0x1e2   : > { %v2063_v37 = vsel %vm2062_vm12, %v2845_v1, %v2059_v51  ;;  %v1353_v20 = vmul.f32 %v2853_v11, %v1352_v34  ;;  %v1832_v42 = vsub.f32 1.0, %v1831_v27  ;;  %v1842_v43 = vor.u32 1.1754944e-38, %v1841_v24  ;;  %vm1357_vm4 = vmor %vm1355_vm8, %vm1356_vm1  ;;  %v816_v24 = vpop.xlane.xlu1 %815 }
 0x1e3   : > { %v2068_v35 = vsel %vm4240_vm5, %v2067_v10, %v2063_v37  ;;  %v1594_v33 = vadd.f32 %v2851_v16, %v1593_v28  ;;  %vm4286_vm2 = vcmp.eq.f32.partialorder %v1374_v32, 8.507059e+37  ;;  %v1367_v50 = vsub.f32 1.0, %v1366_v41 }
 0x1e4   : > { %2260 = vst.msk [vmem:[%s3730_s19 + $0x1b0] sm:$0xff] %vm2205_vm0, %v2068_v35  ;;  %v1354_v46 = vadd.f32 %v2853_v11, %v1353_v20  ;;  %v1377_v53 = vor.u32 1.1754944e-38, %v1376_v63  ;;  %2862 = vrcp.f32 %v4274_v3  ;;  %v2861_v12 = vpop.eup %2860  ;;  %v1833_v60 = vmul.f32 %v2857_v14, %v1832_v42 }
 0x1e5   : > { %v1598_v59 = vsel %vm1597_vm3, %v2851_v16, %v1594_v33  ;;  %vm1836_vm5 = vweird.f32 %v2857_v14  ;;  %vm1371_vm6 = vweird.f32 %v2859_v31  ;;  %v1368_v57 = vmul.f32 %v2859_v31, %v1367_v50 }
 0x1e6   : > { %v1603_v55 = vsel %vm4255_vm9, %v1602_v23, %v1598_v59  ;;  %v1358_v47 = vsel %vm1357_vm4, %v2853_v11, %v1354_v46  ;;  %v2071_v56 = vmul.f32 %v2861_v12, %v4252_v18  ;;  %v1834_v61 = vadd.f32 %v2857_v14, %v1833_v60  ;;  %vm1837_vm7 = vmor %vm1835_vm10, %vm1836_vm5 }
 0x1e7   : > { %2229 = vst.msk [vmem:[%s3730_s19 + $0xb8] sm:$0xff] %vm2205_vm0, %v1603_v55  ;;  %v1363_v52 = vsel %vm4261_vm11, %v1362_v29, %v1358_v47  ;;  %v2079_v49 = vand.u32 2147483647, %v4252_v18  ;;  %v2081_v58 = vand.u32 2147483648, %v4252_v18  ;;  %v1369_v1 = vadd.f32 %v2859_v31, %v1368_v57  ;;  %vm1372_vm9 = vmor %vm1370_vm13, %vm1371_vm6 }
 0x1e8   : > { %2213 = vst.msk [vmem:[%s3730_s19 + $0x38] sm:$0xff] %vm2205_vm0, %v1363_v52  ;;  %v2072_v4 = vsub.f32 1.0, %v2071_v56  ;;  %vm2076_vm8 = vweird.f32 %v2861_v12  ;;  %v4309_v5 = vadd.f32 1.0, %v2855_v30  ;;  %v1838_v54 = vsel %vm1837_vm7, %v2857_v14, %v1834_v61 }
 0x1e9   : > { %2864 = vpow2.f32 %v4248_v6  ;;  %v934_v8 = vadd.f32 %v3595_v38, %v814_v36  ;;  %v966_v13 = vadd.f32 %v3595_v38, %v878_v45  ;;  %v1843_v7 = vsel %vm4277_vm15, %v1842_v43, %v1838_v54 }
 0x1ea   : > { %v2863_v62 = vpop.eup %2862  ;;  %v1373_v15 = vsel %vm1372_vm9, %v2859_v31, %v1369_v1  ;;  %v2073_v0 = vmul.f32 %v2861_v12, %v2072_v4  ;;  %2866 = vrcp.f32 %v4309_v5  ;;  %2245 = vst.msk [vmem:[%s3730_s19 + $0x138] sm:$0xff] %vm2205_vm0, %v1843_v7  ;;  %vm2075_vm11 = vweird.f32 %v4252_v18 }
 0x1eb   : > { %v1378_v48 = vsel %vm4286_vm2, %v1377_v53, %v1373_v15  ;;  %vm4325_vm10 = vcmp.eq.f32.partialorder %v2079_v49, 8.507059e+37  ;;  %v1606_v6 = vmul.f32 %v2863_v62, %v4274_v3  ;;  %v2082_v11 = vor.u32 1.1754944e-38, %v2081_v58  ;;  %vm2077_vm12 = vmor %vm2075_vm11, %vm2076_vm8 }
 0x1ec   : > { %2214 = vst.msk [vmem:[%s3730_s19 + $0x40] sm:$0xff] %vm2205_vm0, %v1378_v48  ;;  %v2074_v16 = vadd.f32 %v2861_v12, %v2073_v0  ;;  %v1614_v19 = vand.u32 2147483647, %v4274_v3  ;;  %v2425_v21 = vmul.f32 -1.442695, %v934_v8  ;;  %v950_v18 = vadd.f32 %v3595_v38, %v846_v39  ;;  %v880_v39 = vpop.xlane.xlu0 %879 }
 0x1ed   : > { %v1607_v22 = vsub.f32 1.0, %v1606_v6  ;;  %v2457_v23 = vmul.f32 -1.442695, %v966_v13  ;;  %v982_v9 = vadd.f32 %v3595_v38, %v910_v2  ;;  %vm1611_vm13 = vweird.f32 %v2863_v62 }
 0x1ee   : > { %v2078_v17 = vsel %vm2077_vm12, %v2861_v12, %v2074_v16  ;;  %v1616_v29 = vand.u32 2147483648, %v4274_v3  ;;  %2868 = vpow2.f32 %v2425_v21  ;;  %v2441_v32 = vmul.f32 -1.442695, %v950_v18 }
 0x1ef   : > { %v2865_v30 = vpop.eup %2864  ;;  %v2083_v51 = vsel %vm4325_vm10, %v2082_v11, %v2078_v17  ;;  %v1608_v25 = vmul.f32 %v2863_v62, %v1607_v22  ;;  %2870 = vpow2.f32 %v2457_v23  ;;  %vm1610_vm14 = vweird.f32 %v4274_v3 }
 0x1f0   : > { %v4339_v14 = vpop.eup %2866  ;;  %2261 = vst.msk [vmem:[%s3730_s19 + $0x1b8] sm:$0xff] %vm2205_vm0, %v2083_v51  ;;  %v4344_v34 = vadd.f32 1.0, %v2865_v30  ;;  %v2473_v63 = vmul.f32 -1.442695, %v982_v9  ;;  %v951_v36 = vadd.f32 %v3595_v38, %v848_v26  ;;  %2872 = vpow2.f32 %v2441_v32  ;;  %vm1612_vm15 = vmor %vm1610_vm14, %vm1611_vm13 }
 0x1f1   : > { %v1609_v31 = vadd.f32 %v2863_v62, %v1608_v25  ;;  %v2086_v37 = vmul.f32 %v4339_v14, %v4309_v5  ;;  %v935_v28 = vadd.f32 %v3595_v38, %v816_v24  ;;  %vm1615_vm1 = vcmp.eq.f32.partialorder %v1614_v19, 8.507059e+37 }
 0x1f2   : > { %v1617_v27 = vor.u32 1.1754944e-38, %v1616_v29  ;;  %v2094_v3 = vand.u32 2147483647, %v4309_v5  ;;  %2874 = vrcp.f32 %v4344_v34  ;;  %v2442_v20 = vmul.f32 -1.442695, %v951_v36 }
 0x1f3   : > { %v1613_v40 = vsel %vm1612_vm15, %v2863_v62, %v1609_v31  ;;  %v2087_v35 = vsub.f32 1.0, %v2086_v37  ;;  %2876 = vpow2.f32 %v2473_v63  ;;  %vm2091_vm2 = vweird.f32 %v4339_v14 }
 0x1f4   : > { %v2869_v41 = vpop.eup %2868  ;;  %v1618_v33 = vsel %vm1615_vm1, %v1617_v27, %v1613_v40  ;;  %v2096_v42 = vand.u32 2147483648, %v4309_v5  ;;  %v1854_v43 = vand.u32 2147483647, %v4344_v34  ;;  %2878 = vpow2.f32 %v2442_v20 }
 0x1f5   : > { %v2871_v44 = vpop.eup %2870  ;;  %2230 = vst.msk [vmem:[%s3730_s19 + $0xc0] sm:$0xff] %vm2205_vm0, %v1618_v33  ;;  %v2088_v45 = vmul.f32 %v4339_v14, %v2087_v35  ;;  %v4364_v46 = vadd.f32 1.0, %v2869_v41  ;;  %v2426_v50 = vmul.f32 -1.442695, %v935_v28  ;;  %vm2090_vm3 = vweird.f32 %v4309_v5 }
 0x1f6   : > { %v4368_v53 = vadd.f32 1.0, %v2871_v44  ;;  %v2873_v12 = vpop.eup %2872  ;;  %vm4374_vm4 = vcmp.eq.f32.partialorder %v2094_v3, 8.507059e+37  ;;  %vm4383_vm5 = vmor %vm2090_vm3, %vm2091_vm2  ;;  %v2097_v57 = vor.u32 1.1754944e-38, %v2096_v42  ;;  %vm1850_vm6 = vweird.f32 %v4344_v34 }
 0x1f7   : > { %v2089_v59 = vadd.f32 %v4339_v14, %v2088_v45  ;;  %2880 = vrcp.f32 %v4364_v46  ;;  %v1856_v56 = vand.u32 2147483648, %v4344_v34 }
 0x1f8   : > { %v4379_v55 = vpop.eup %2874  ;;  %2882 = vrcp.f32 %v4368_v53 }
 0x1f9   : > { %3071 = shalt.err (!%p3068_p12)
}
 0x1fa   : > { %s3119_s8 = smov 128   ;;  %s3120_s28 = smov 8   ;;  %v2877_v52 = vpop.eup %2876  ;;  %v2093_v61 = vsel %vm4383_vm5, %v4339_v14, %v2089_v59  ;;  %v1846_v49 = vmul.f32 %v4379_v55, %v4344_v34  ;;  %vm4409_vm7 = vcmp.eq.f32.partialorder %v1854_v43, 8.507059e+37  ;;  %2884 = vpow2.f32 %v2426_v50  ;;  %v818_v4 = vpop.xlane.xlu2 %817 }
 0x1fb   : > { %2541 = dma.vmem_to_hbm [thread:$0]  (%p3228_p3), %s4366_s15, 8192, %s4370_s4, %s2276_s10, %s3119_s8, %s3119_s8, %s3120_s28   ;;  %v967_v1 = vadd.f32 %v3595_v38, %v880_v39  ;;  %v912_v5 = vpop.xlane.xlu1 %911  ;;  %v2098_v54 = vsel %vm4374_vm4, %v2097_v57, %v2093_v61  ;;  %v1389_v8 = vand.u32 2147483647, %v4364_v46  ;;  %v1391_v13 = vand.u32 2147483648, %v4364_v46  ;;  %v2879_v7 = vpop.eup %2878 }
 0x1fc   : > { %v1869_v62 = vand.u32 2147483647, %v4368_v53  ;;  %2262 = vst.msk [vmem:[%s3730_s19 + $0x1c0] sm:$0xff] %vm2205_vm0, %v2098_v54  ;;  %v1847_v15 = vsub.f32 1.0, %v1846_v49  ;;  %v1871_v0 = vand.u32 2147483648, %v4368_v53  ;;  %v4422_v2 = vadd.f32 1.0, %v2873_v12 }
 0x1fd   : > { %v4424_v48 = vadd.f32 1.0, %v2877_v52  ;;  %v1857_v10 = vor.u32 1.1754944e-38, %v1856_v56  ;;  %vm1385_vm8 = vweird.f32 %v4364_v46  ;;  %v936_v6 = vadd.f32 %v3595_v38, %v818_v4  ;;  %v2881_v11 = vpop.eup %2880  ;;  %v850_v52 = vpop.xlane.xlu0 %849 }
 0x1fe   : > { %v983_v16 = vadd.f32 %v3595_v38, %v912_v5  ;;  %v1848_v19 = vmul.f32 %v4379_v55, %v1847_v15  ;;  %vm1851_vm9 = vweird.f32 %v4379_v55  ;;  %vm1865_vm11 = vweird.f32 %v4368_v53  ;;  %v2883_v22 = vpop.eup %2882 }
 0x1ff   : > { %2886 = vrcp.f32 %v4422_v2  ;;  %v4433_v21 = vadd.f32 1.0, %v2879_v7  ;;  %v1381_v23 = vmul.f32 %v2881_v11, %v4364_v46  ;;  %vm4436_vm10 = vcmp.eq.f32.partialorder %v1389_v8, 8.507059e+37  ;;  %vm1852_vm13 = vmor %vm1850_vm6, %vm1851_vm9 }
 0x200   : > { %v1392_v9 = vor.u32 1.1754944e-38, %v1391_v13  ;;  %2888 = vrcp.f32 %v4424_v48  ;;  %v2885_v26 = vpop.eup %2884  ;;  %v1849_v17 = vadd.f32 %v4379_v55, %v1848_v19  ;;  %v1861_v29 = vmul.f32 %v2883_v22, %v4368_v53 }
 0x201   : > { %vm4443_vm12 = vcmp.eq.f32.partialorder %v1869_v62, 8.507059e+37  ;;  %v1872_v30 = vor.u32 1.1754944e-38, %v1871_v0  ;;  %v2458_v51 = vmul.f32 -1.442695, %v967_v1  ;;  %v1382_v25 = vsub.f32 1.0, %v1381_v23 }
 0x202   : > { %v1629_v32 = vand.u32 2147483647, %v4422_v2  ;;  %v1631_v14 = vand.u32 2147483648, %v4422_v2  ;;  %v2427_v63 = vmul.f32 -1.442695, %v936_v6  ;;  %v1853_v36 = vsel %vm1852_vm13, %v4379_v55, %v1849_v17  ;;  %v914_v4 = vpop.xlane.xlu2 %913 }
 0x203   : > { %v1862_v31 = vsub.f32 1.0, %v1861_v29  ;;  %v2109_v37 = vand.u32 2147483647, %v4424_v48  ;;  %2890 = vrcp.f32 %v4433_v21  ;;  %v1858_v28 = vsel %vm4409_vm7, %v1857_v10, %v1853_v36  ;;  %v882_v13 = vpop.xlane.xlu1 %881 }
 0x204   : > { %v1383_v27 = vmul.f32 %v2881_v11, %v1382_v25  ;;  %vm1386_vm14 = vweird.f32 %v2881_v11  ;;  %v2111_v34 = vand.u32 2147483648, %v4424_v48  ;;  %2246 = vst.msk [vmem:[%s3730_s19 + $0x140] sm:$0xff] %vm2205_vm0, %v1858_v28  ;;  %vm1866_vm15 = vweird.f32 %v2883_v22 }
 0x205   : > { %v2887_v3 = vpop.eup %2886  ;;  %v1863_v40 = vmul.f32 %v2883_v22, %v1862_v31  ;;  %vm1625_vm1 = vweird.f32 %v4422_v2  ;;  %v2474_v35 = vmul.f32 -1.442695, %v983_v16  ;;  %vm4463_vm2 = vcmp.eq.f32.partialorder %v1629_v32, 8.507059e+37  ;;  %vm1387_vm3 = vmor %vm1385_vm8, %vm1386_vm14  ;;  %v820_v31 = vpop.xlane.xlu0 %819 }
 0x206   : > { %v2889_v20 = vpop.eup %2888  ;;  %v1384_v41 = vadd.f32 %v2881_v11, %v1383_v27  ;;  %v1621_v33 = vmul.f32 %v2887_v3, %v4422_v2  ;;  %v1632_v43 = vor.u32 1.1754944e-38, %v1631_v14  ;;  %v4467_v44 = vadd.f32 1.0, %v2885_v26  ;;  %vm1867_vm6 = vmor %vm1865_vm11, %vm1866_vm15 }
 0x207   : > { %v1864_v45 = vadd.f32 %v2883_v22, %v1863_v40  ;;  %v2101_v50 = vmul.f32 %v2889_v20, %v4424_v48  ;;  %vm2105_vm4 = vweird.f32 %v4424_v48  ;;  %vm4473_vm5 = vcmp.eq.f32.partialorder %v2109_v37, 8.507059e+37 }
 0x208   : > { %v1388_v12 = vsel %vm1387_vm3, %v2881_v11, %v1384_v41  ;;  %v1622_v59 = vsub.f32 1.0, %v1621_v33  ;;  %v2112_v60 = vor.u32 1.1754944e-38, %v2111_v34  ;;  %vm1640_vm7 = vweird.f32 %v4433_v21 }
 0x209   : > { %2892 = vrcp.f32 %v4467_v44  ;;  %v2891_v46 = vpop.eup %2890  ;;  %v1393_v55 = vsel %vm4436_vm10, %v1392_v9, %v1388_v12  ;;  %v1868_v47 = vsel %vm1867_vm6, %v2883_v22, %v1864_v45  ;;  %v2102_v57 = vsub.f32 1.0, %v2101_v50 }
 0x20a   : > { %v1644_v56 = vand.u32 2147483647, %v4433_v21  ;;  %2215 = vst.msk [vmem:[%s3730_s19 + $0x48] sm:$0xff] %vm2205_vm0, %v1393_v55  ;;  %v1873_v53 = vsel %vm4443_vm12, %v1872_v30, %v1868_v47  ;;  %v1623_v61 = vmul.f32 %v2887_v3, %v1622_v59  ;;  %vm1626_vm8 = vweird.f32 %v2887_v3 }
 0x20b   : > { %v1636_v49 = vmul.f32 %v2891_v46, %v4433_v21  ;;  %2247 = vst.msk [vmem:[%s3730_s19 + $0x148] sm:$0xff] %vm2205_vm0, %v1873_v53  ;;  %v2103_v58 = vmul.f32 %v2889_v20, %v2102_v57  ;;  %vm2106_vm9 = vweird.f32 %v2889_v20  ;;  %v1646_v1 = vand.u32 2147483648, %v4433_v21  ;;  %vm1627_vm11 = vmor %vm1625_vm1, %vm1626_vm8 }
 0x20c   : > { %2894 = vpow2.f32 %v2458_v51  ;;  %v1624_v5 = vadd.f32 %v2887_v3, %v1623_v61  ;;  %v952_v8 = vadd.f32 %v3595_v38, %v850_v52  ;;  %vm1641_vm10 = vweird.f32 %v2891_v46  ;;  %vm2107_vm13 = vmor %vm2105_vm4, %vm2106_vm9 }
 0x20d   : > { %v1637_v54 = vsub.f32 1.0, %v1636_v49  ;;  %2896 = vpow2.f32 %v2427_v63  ;;  %v2104_v62 = vadd.f32 %v2889_v20, %v2103_v58  ;;  %vm4496_vm12 = vcmp.eq.f32.partialorder %v1644_v56, 8.507059e+37  ;;  %vm1642_vm14 = vmor %vm1640_vm7, %vm1641_vm10  ;;  %v916_v7 = vpop.xlane.xlu0 %915 }
 0x20e   : > { %2898 = vpow2.f32 %v2474_v35  ;;  %v1628_v0 = vsel %vm1627_vm11, %v2887_v3, %v1624_v5  ;;  %v2443_v6 = vmul.f32 -1.442695, %v952_v8  ;;  %v984_v2 = vadd.f32 %v3595_v38, %v914_v4  ;;  %v884_v35 = vpop.xlane.xlu2 %883 }
 0x20f   : > { %v2893_v15 = vpop.eup %2892  ;;  %v1638_v10 = vmul.f32 %v2891_v46, %v1637_v54  ;;  %v1633_v16 = vsel %vm4463_vm2, %v1632_v43, %v1628_v0  ;;  %v2108_v11 = vsel %vm2107_vm13, %v2889_v20, %v2104_v62  ;;  %v1647_v19 = vor.u32 1.1754944e-38, %v1646_v1  ;;  %v852_v20 = vpop.xlane.xlu1 %851 }
 0x210   : > { %v1396_v22 = vmul.f32 %v2893_v15, %v4467_v44  ;;  %2231 = vst.msk [vmem:[%s3730_s19 + $0xc8] sm:$0xff] %vm2205_vm0, %v1633_v16  ;;  %v2113_v23 = vsel %vm4473_vm5, %v2112_v60, %v2108_v11  ;;  %2900 = vpow2.f32 %v2443_v6  ;;  %v2475_v48 = vmul.f32 -1.442695, %v984_v2 }
 0x211   : > { %v1639_v18 = vadd.f32 %v2891_v46, %v1638_v10  ;;  %2263 = vst.msk [vmem:[%s3730_s19 + $0x1c8] sm:$0xff] %vm2205_vm0, %v2113_v23  ;;  %v1404_v17 = vand.u32 2147483647, %v4467_v44  ;;  %v1406_v29 = vand.u32 2147483648, %v4467_v44  ;;  %v968_v24 = vadd.f32 %v3595_v38, %v882_v13 }
 0x212   : > { %v2895_v9 = vpop.eup %2894  ;;  %v1397_v26 = vsub.f32 1.0, %v1396_v22  ;;  %vm1401_vm15 = vweird.f32 %v2893_v15  ;;  %2902 = vpow2.f32 %v2475_v48  ;;  %vm1400_vm1 = vweird.f32 %v4467_v44 }
 0x213   : > { %v2897_v30 = vpop.eup %2896  ;;  %v1643_v51 = vsel %vm1642_vm14, %v2891_v46, %v1639_v18  ;;  %v4519_v25 = vadd.f32 1.0, %v2895_v9  ;;  %v2459_v36 = vmul.f32 -1.442695, %v968_v24  ;;  %vm1405_vm2 = vcmp.eq.f32.partialorder %v1404_v17, 8.507059e+37  ;;  %vm1402_vm3 = vmor %vm1400_vm1, %vm1401_vm15 }
 0x214   : > { %v2899_v32 = vpop.eup %2898  ;;  %v1648_v14 = vsel %vm4496_vm12, %v1647_v19, %v1643_v51  ;;  %v1398_v21 = vmul.f32 %v2893_v15, %v1397_v26  ;;  %v4523_v63 = vadd.f32 1.0, %v2897_v30  ;;  %v1407_v27 = vor.u32 1.1754944e-38, %v1406_v29 }
 0x215   : > { %2232 = vst.msk [vmem:[%s3730_s19 + $0xd0] sm:$0xff] %vm2205_vm0, %v1648_v14  ;;  %2904 = vrcp.f32 %v4519_v25  ;;  %v1884_v34 = vand.u32 2147483647, %v4519_v25  ;;  %v4532_v3 = vadd.f32 1.0, %v2899_v32  ;;  %v937_v40 = vadd.f32 %v3595_v38, %v820_v31 }
 0x216   : > { %v1399_v37 = vadd.f32 %v2893_v15, %v1398_v21  ;;  %2906 = vrcp.f32 %v4523_v63  ;;  %v2901_v28 = vpop.eup %2900  ;;  %v1886_v33 = vand.u32 2147483648, %v4519_v25  ;;  %v1419_v45 = vand.u32 2147483647, %v4523_v63  ;;  %v854_v9 = vpop.xlane.xlu2 %853 }
 0x217   : > { %v4536_v42 = vadd.f32 1.0, %v2901_v28  ;;  %2908 = vpow2.f32 %v2459_v36  ;;  %v1421_v50 = vand.u32 2147483648, %v4523_v63  ;;  %v969_v39 = vadd.f32 %v3595_v38, %v884_v35 }
 0x218   : > { %v1403_v41 = vsel %vm1402_vm3, %v2893_v15, %v1399_v37  ;;  %v2903_v43 = vpop.eup %2902  ;;  %2910 = vrcp.f32 %v4532_v3  ;;  %v4546_v12 = vadd.f32 %v3595_v38, %v852_v20  ;;  %vm1880_vm4 = vweird.f32 %v4519_v25 }
 0x219   : > { %v1408_v44 = vsel %vm1405_vm2, %v1407_v27, %v1403_v41  ;;  %2912 = vrcp.f32 %v4536_v42  ;;  %vm1415_vm5 = vweird.f32 %v4523_v63  ;;  %v4550_v60 = vadd.f32 1.0, %v2903_v43 }
 0x21a   : > { %2216 = vst.msk [vmem:[%s3730_s19 + $0x50] sm:$0xff] %vm2205_vm0, %v1408_v44  ;;  %v2428_v46 = vmul.f32 -1.442695, %v937_v40  ;;  %vm4553_vm6 = vcmp.eq.f32.partialorder %v1884_v34, 8.507059e+37  ;;  %v1887_v56 = vor.u32 1.1754944e-38, %v1886_v33  ;;  %v2126_v53 = vand.u32 2147483648, %v4532_v3  ;;  %v822_v34 = vpop.xlane.xlu1 %821 }
 0x21b   : > { %v2905_v59 = vpop.eup %2904  ;;  %v2124_v52 = vand.u32 2147483647, %v4532_v3  ;;  %vm4560_vm7 = vcmp.eq.f32.partialorder %v1419_v45, 8.507059e+37  ;;  %v1659_v58 = vand.u32 2147483647, %v4536_v42  ;;  %v1661_v1 = vand.u32 2147483648, %v4536_v42 }
 0x21c   : > { %v2907_v55 = vpop.eup %2906  ;;  %v1876_v47 = vmul.f32 %v2905_v59, %v4519_v25  ;;  %v1422_v54 = vor.u32 1.1754944e-38, %v1421_v50  ;;  %vm2120_vm8 = vweird.f32 %v4532_v3  ;;  %2914 = vrcp.f32 %v4550_v60 }
 0x21d   : > { %v1411_v61 = vmul.f32 %v2907_v55, %v4523_v63  ;;  %v2909_v4 = vpop.eup %2908  ;;  %vm1881_vm9 = vweird.f32 %v2905_v59  ;;  %vm1655_vm11 = vweird.f32 %v4536_v42  ;;  %2916 = vpow2.f32 %v2428_v46 }
 0x21e   : > { %v1877_v5 = vsub.f32 1.0, %v1876_v47  ;;  %v2911_v8 = vpop.eup %2910  ;;  %v4569_v62 = vadd.f32 1.0, %v2909_v4  ;;  %vm1416_vm10 = vweird.f32 %v2907_v55  ;;  %vm4572_vm12 = vcmp.eq.f32.partialorder %v2124_v52, 8.507059e+37  ;;  %vm1882_vm14 = vmor %vm1880_vm4, %vm1881_vm9 }
 0x21f   : > { %v1412_v13 = vsub.f32 1.0, %v1411_v61  ;;  %v2913_v15 = vpop.eup %2912  ;;  %v2116_v10 = vmul.f32 %v2911_v8, %v4532_v3  ;;  %v2127_v2 = vor.u32 1.1754944e-38, %v2126_v53  ;;  %vm4577_vm13 = vcmp.eq.f32.partialorder %v1659_v58, 8.507059e+37  ;;  %vm1417_vm2 = vmor %vm1415_vm5, %vm1416_vm10  ;;  %v824_v61 = vpop.xlane.xlu2 %823 }
 0x220   : > { %v1878_v0 = vmul.f32 %v2905_v59, %v1877_v5  ;;  %v1651_v11 = vmul.f32 %v2913_v15, %v4536_v42  ;;  %v1662_v22 = vor.u32 1.1754944e-38, %v1661_v1  ;;  %v2139_v48 = vand.u32 2147483647, %v4550_v60 }
 0x221   : > { %v1413_v16 = vmul.f32 %v2907_v55, %v1412_v13  ;;  %v2117_v18 = vsub.f32 1.0, %v2116_v10  ;;  %2918 = vrcp.f32 %v4569_v62  ;;  %vm2121_vm15 = vweird.f32 %v2911_v8 }
 0x222   : > { %v1879_v23 = vadd.f32 %v2905_v59, %v1878_v0  ;;  %v1652_v17 = vsub.f32 1.0, %v1651_v11  ;;  %vm2135_vm1 = vweird.f32 %v4550_v60  ;;  %v2141_v29 = vand.u32 2147483648, %v4550_v60  ;;  %v2915_v24 = vpop.eup %2914  ;;  %vm2122_vm4 = vmor %vm2120_vm8, %vm2121_vm15 }
 0x223   : > { %v1414_v26 = vadd.f32 %v2907_v55, %v1413_v16  ;;  %v2118_v51 = vmul.f32 %v2911_v8, %v2117_v18  ;;  %vm1656_vm3 = vweird.f32 %v2913_v15  ;;  %v2460_v32 = vmul.f32 -1.442695, %v969_v39  ;;  %v2917_v25 = vpop.eup %2916 }
 0x224   : > { %v1883_v30 = vsel %vm1882_vm14, %v2905_v59, %v1879_v23  ;;  %v1653_v36 = vmul.f32 %v2913_v15, %v1652_v17  ;;  %v2131_v31 = vmul.f32 %v2915_v24, %v4550_v60  ;;  %v1901_v63 = vand.u32 2147483648, %v4569_v62 }
 0x225   : > { %v1888_v14 = vsel %vm4553_vm6, %v1887_v56, %v1883_v30  ;;  %v1418_v21 = vsel %vm1417_vm2, %v2907_v55, %v1414_v26  ;;  %v2119_v28 = vadd.f32 %v2911_v8, %v2118_v51  ;;  %v2444_v27 = vmul.f32 -1.442695, %v4546_v12  ;;  %vm1657_vm6 = vmor %vm1655_vm11, %vm1656_vm3  ;;  %v886_v12 = vpop.xlane.xlu0 %885 }
 0x226   : > { %2248 = vst.msk [vmem:[%s3730_s19 + $0x150] sm:$0xff] %vm2205_vm0, %v1888_v14  ;;  %v1423_v37 = vsel %vm4560_vm7, %v1422_v54, %v1418_v21  ;;  %v1654_v40 = vadd.f32 %v2913_v15, %v1653_v36  ;;  %v2132_v35 = vsub.f32 1.0, %v2131_v31  ;;  %vm2136_vm5 = vweird.f32 %v2915_v24 }
 0x227   : > { %2217 = vst.msk [vmem:[%s3730_s19 + $0x58] sm:$0xff] %vm2205_vm0, %v1423_v37  ;;  %v4605_v20 = vadd.f32 1.0, %v2917_v25  ;;  %v2919_v41 = vpop.eup %2918  ;;  %v2123_v33 = vsel %vm2122_vm4, %v2911_v8, %v2119_v28  ;;  %2920 = vpow2.f32 %v2460_v32  ;;  %v985_v43 = vadd.f32 %v3595_v38, %v916_v7  ;;  %vm2137_vm9 = vmor %vm2135_vm1, %vm2136_vm5 }
 0x228   : > { %v954_v44 = vadd.f32 %v3595_v38, %v854_v9  ;;  %v2128_v3 = vsel %vm4572_vm12, %v2127_v2, %v2123_v33  ;;  %v1658_v45 = vsel %vm1657_vm6, %v2913_v15, %v1654_v40  ;;  %v2133_v50 = vmul.f32 %v2915_v24, %v2132_v35  ;;  %v888_v2 = vpop.xlane.xlu1 %887 }
 0x229   : > { %v1891_v39 = vmul.f32 %v2919_v41, %v4569_v62  ;;  %2264 = vst.msk [vmem:[%s3730_s19 + $0x1d0] sm:$0xff] %vm2205_vm0, %v2128_v3  ;;  %v1663_v59 = vsel %vm4577_vm13, %v1662_v22, %v1658_v45  ;;  %vm4619_vm7 = vcmp.eq.f32.partialorder %v2139_v48, 8.507059e+37  ;;  %v2142_v46 = vor.u32 1.1754944e-38, %v2141_v29 }
 0x22a   : > { %2922 = vrcp.f32 %v4605_v20  ;;  %2233 = vst.msk [vmem:[%s3730_s19 + $0xd8] sm:$0xff] %vm2205_vm0, %v1663_v59  ;;  %v2134_v55 = vadd.f32 %v2915_v24, %v2133_v50  ;;  %vm1895_vm8 = vweird.f32 %v4569_v62  ;;  %v1899_v57 = vand.u32 2147483647, %v4569_v62 }
 0x22b   : > { %v1892_v47 = vsub.f32 1.0, %v1891_v39  ;;  %2924 = vpow2.f32 %v2444_v27  ;;  %v2476_v56 = vmul.f32 -1.442695, %v985_v43  ;;  %v2445_v52 = vmul.f32 -1.442695, %v954_v44 }
 0x22c   : > { %v938_v53 = vadd.f32 %v3595_v38, %v822_v34  ;;  %v2138_v49 = vsel %vm2137_vm9, %v2915_v24, %v2134_v55  ;;  %vm1896_vm11 = vweird.f32 %v2919_v41  ;;  %v1902_v1 = vor.u32 1.1754944e-38, %v1901_v63 }
 0x22d   : > { %v1893_v58 = vmul.f32 %v2919_v41, %v1892_v47  ;;  %v2921_v4 = vpop.eup %2920  ;;  %v2143_v5 = vsel %vm4619_vm7, %v2142_v46, %v2138_v49  ;;  %2926 = vpow2.f32 %v2476_v56  ;;  %v970_v60 = vadd.f32 %v3595_v38, %v886_v12  ;;  %vm1897_vm10 = vmor %vm1895_vm8, %vm1896_vm11  ;;  %v856_v9 = vpop.xlane.xlu0 %855 }
 0x22e   : > { %v2429_v54 = vmul.f32 -1.442695, %v938_v53  ;;  %2265 = vst.msk [vmem:[%s3730_s19 + $0x1d8] sm:$0xff] %vm2205_vm0, %v2143_v5  ;;  %v4637_v13 = vadd.f32 1.0, %v2921_v4  ;;  %2928 = vpow2.f32 %v2445_v52  ;;  %v939_v7 = vadd.f32 %v3595_v38, %v824_v61 }
 0x22f   : > { %v1894_v8 = vadd.f32 %v2919_v41, %v1893_v58  ;;  %v1434_v0 = vand.u32 2147483647, %v4605_v20  ;;  %v1436_v10 = vand.u32 2147483648, %v4605_v20  ;;  %v2461_v6 = vmul.f32 -1.442695, %v970_v60 }
 0x230   : > { %v2923_v15 = vpop.eup %2922  ;;  %2930 = vpow2.f32 %v2429_v54  ;;  %vm1900_vm12 = vcmp.eq.f32.partialorder %v1899_v57, 8.507059e+37  ;;  %v2430_v18 = vmul.f32 -1.442695, %v939_v7  ;;  %v971_v48 = vadd.f32 %v3595_v38, %v888_v2  ;;  %v4718_v2 = vpop.xlane.xlu2 %889 }
 0x231   : > { %v1898_v16 = vsel %vm1897_vm10, %v2919_v41, %v1894_v8  ;;  %v1426_v11 = vmul.f32 %v2923_v15, %v4605_v20  ;;  %2932 = vrcp.f32 %v4637_v13  ;;  %v2925_v19 = vpop.eup %2924  ;;  %vm1430_vm13 = vweird.f32 %v4605_v20 }
 0x232   : > { %v1903_v22 = vsel %vm1900_vm12, %v1902_v1, %v1898_v16  ;;  %v4648_v62 = vadd.f32 1.0, %v2925_v19  ;;  %vm4652_vm14 = vcmp.eq.f32.partialorder %v1434_v0, 8.507059e+37  ;;  %v1437_v29 = vor.u32 1.1754944e-38, %v1436_v10  ;;  %v4720_v16 = vpop.xlane.xlu1 %857 }
 0x233   : > { %2249 = vst.msk [vmem:[%s3730_s19 + $0x158] sm:$0xff] %vm2205_vm0, %v1903_v22  ;;  %v1427_v23 = vsub.f32 1.0, %v1426_v11  ;;  %v2927_v26 = vpop.eup %2926  ;;  %2934 = vpow2.f32 %v2461_v6  ;;  %vm1431_vm15 = vweird.f32 %v2923_v15  ;;  %v1914_v51 = vand.u32 2147483647, %v4637_v13 }
 0x234   : > { %v2929_v24 = vpop.eup %2928  ;;  %2936 = vrcp.f32 %v4648_v62  ;;  %v1916_v25 = vand.u32 2147483648, %v4637_v13  ;;  %v4659_v14 = vadd.f32 1.0, %v2927_v26  ;;  %v955_v36 = vadd.f32 %v3595_v38, %v856_v9  ;;  %vm1432_vm2 = vmor %vm1430_vm13, %vm1431_vm15 }
 0x235   : > { %v1428_v30 = vmul.f32 %v2923_v15, %v1427_v23  ;;  %v4661_v21 = vadd.f32 1.0, %v2929_v24  ;;  %vm1910_vm1 = vweird.f32 %v4637_v13  ;;  %2938 = vpow2.f32 %v2430_v18  ;;  %v826_v26 = vpop.xlane.xlu0 %825 }
 0x236   : > { %v2931_v32 = vpop.eup %2930  ;;  %v2462_v28 = vmul.f32 -1.442695, %v971_v48  ;;  %v1674_v27 = vand.u32 2147483647, %v4648_v62  ;;  %2940 = vrcp.f32 %v4659_v14  ;;  %vm4672_vm3 = vcmp.eq.f32.partialorder %v1914_v51, 8.507059e+37 }
 0x237   : > { %v2933_v31 = vpop.eup %2932  ;;  %v1429_v37 = vadd.f32 %v2923_v15, %v1428_v30  ;;  %v4670_v34 = vadd.f32 1.0, %v2931_v32  ;;  %v1676_v41 = vand.u32 2147483648, %v4648_v62  ;;  %v2156_v33 = vand.u32 2147483648, %v4659_v14 }
 0x238   : > { %v1906_v63 = vmul.f32 %v2933_v31, %v4637_v13  ;;  %v1917_v3 = vor.u32 1.1754944e-38, %v1916_v25  ;;  %2942 = vrcp.f32 %v4661_v21  ;;  %vm1670_vm4 = vweird.f32 %v4648_v62 }
 0x239   : > { %v1433_v40 = vsel %vm1432_vm2, %v2923_v15, %v1429_v37  ;;  %v2935_v20 = vpop.eup %2934  ;;  %v2154_v50 = vand.u32 2147483647, %v4659_v14  ;;  %2944 = vpow2.f32 %v2462_v28  ;;  %v4685_v39 = vmul.f32 -1.442695, %v955_v36 }
 0x23a   : > { %v1438_v43 = vsel %vm4652_vm14, %v1437_v29, %v1433_v40  ;;  %v1907_v44 = vsub.f32 1.0, %v1906_v63  ;;  %v2937_v45 = vpop.eup %2936  ;;  %vm1911_vm5 = vweird.f32 %v2933_v31  ;;  %vm4688_vm6 = vcmp.eq.f32.partialorder %v1674_v27, 8.507059e+37  ;;  %v918_v42 = vpop.xlane.xlu1 %917 }
 0x23b   : > { %2218 = vst.msk [vmem:[%s3730_s19 + $0x60] sm:$0xff] %vm2205_vm0, %v1438_v43  ;;  %v1666_v59 = vmul.f32 %v2937_v45, %v4648_v62  ;;  %2946 = vrcp.f32 %v4670_v34  ;;  %v2939_v46 = vpop.eup %2938  ;;  %v1677_v55 = vor.u32 1.1754944e-38, %v1676_v41  ;;  %vm2150_vm7 = vweird.f32 %v4659_v14  ;;  %vm1912_vm8 = vmor %vm1910_vm1, %vm1911_vm5 }
 0x23c   : > { %v1908_v12 = vmul.f32 %v2933_v31, %v1907_v44  ;;  %v2157_v47 = vor.u32 1.1754944e-38, %v2156_v33  ;;  %v1689_v57 = vand.u32 2147483647, %v4661_v21  ;;  %v2941_v56 = vpop.eup %2940  ;;  %v1691_v61 = vand.u32 2147483648, %v4661_v21 }
 0x23d   : > { %v1667_v53 = vsub.f32 1.0, %v1666_v59  ;;  %v4696_v49 = vadd.f32 1.0, %v2935_v20  ;;  %vm1671_vm9 = vweird.f32 %v2937_v45  ;;  %v2146_v58 = vmul.f32 %v2941_v56, %v4659_v14  ;;  %v920_v59 = vpop.xlane.xlu2 %919 }
 0x23e   : > { %v1909_v52 = vadd.f32 %v2933_v31, %v1908_v12  ;;  %vm4701_vm11 = vcmp.eq.f32.partialorder %v2154_v50, 8.507059e+37  ;;  %vm1685_vm10 = vweird.f32 %v4661_v21  ;;  %v1449_v4 = vand.u32 2147483647, %v4670_v34  ;;  %v2943_v54 = vpop.eup %2942  ;;  %vm1672_vm15 = vmor %vm1670_vm4, %vm1671_vm9 }
 0x23f   : > { %v1451_v5 = vand.u32 2147483648, %v4670_v34  ;;  %v1668_v8 = vmul.f32 %v2937_v45, %v1667_v53  ;;  %2948 = vrcp.f32 %v4696_v49  ;;  %v4709_v13 = vadd.f32 1.0, %v2939_v46  ;;  %v2945_v7 = vpop.eup %2944  ;;  %v922_v53 = vpop.xlane.xlu0 %921 }
 0x240   : > { %v1913_v60 = vsel %vm1912_vm8, %v2933_v31, %v1909_v52  ;;  %v2147_v0 = vsub.f32 1.0, %v2146_v58  ;;  %v1681_v10 = vmul.f32 %v2943_v54, %v4661_v21  ;;  %vm4714_vm12 = vcmp.eq.f32.partialorder %v1689_v57, 8.507059e+37 }
 0x241   : > { %v1918_v15 = vsel %vm4672_vm3, %v1917_v3, %v1913_v60  ;;  %v2947_v11 = vpop.eup %2946  ;;  %v1669_v19 = vadd.f32 %v2937_v45, %v1668_v8  ;;  %vm2151_vm13 = vweird.f32 %v2941_v56  ;;  %v1692_v22 = vor.u32 1.1754944e-38, %v1691_v61 }
 0x242   : > { %2250 = vst.msk [vmem:[%s3730_s19 + $0x160] sm:$0xff] %vm2205_vm0, %v1918_v15  ;;  %vm1445_vm14 = vweird.f32 %v4670_v34  ;;  %v2148_v23 = vmul.f32 %v2941_v56, %v2147_v0  ;;  %v1682_v18 = vsub.f32 1.0, %v1681_v10  ;;  %v1441_v48 = vmul.f32 %v2947_v11, %v4670_v34  ;;  %vm2152_vm3 = vmor %vm2150_vm7, %vm2151_vm13 }
 0x243   : > { %vm4729_vm1 = vcmp.eq.f32.partialorder %v1449_v4, 8.507059e+37  ;;  %v1673_v17 = vsel %vm1672_vm15, %v2937_v45, %v1669_v19  ;;  %vm1686_vm2 = vweird.f32 %v2943_v54  ;;  %v1452_v29 = vor.u32 1.1754944e-38, %v1451_v5 }
 0x244   : > { %2950 = vrcp.f32 %v4709_v13  ;;  %v1678_v24 = vsel %vm4688_vm6, %v1677_v55, %v1673_v17  ;;  %v2149_v62 = vadd.f32 %v2941_v56, %v2148_v23  ;;  %v1683_v30 = vmul.f32 %v2943_v54, %v1682_v18  ;;  %vm1687_vm5 = vmor %vm1685_vm10, %vm1686_vm2 }
 0x245   : > { %v1442_v51 = vsub.f32 1.0, %v1441_v48  ;;  %v2949_v32 = vpop.eup %2948  ;;  %2234 = vst.msk [vmem:[%s3730_s19 + $0xe0] sm:$0xff] %vm2205_vm0, %v1678_v24  ;;  %vm1446_vm4 = vweird.f32 %v2947_v11  ;;  %v1929_v25 = vand.u32 2147483647, %v4696_v49  ;;  %v1931_v36 = vand.u32 2147483648, %v4696_v49 }
 0x246   : > { %v4743_v31 = vadd.f32 1.0, %v2945_v7  ;;  %v2153_v37 = vsel %vm2152_vm3, %v2941_v56, %v2149_v62  ;;  %v1684_v28 = vadd.f32 %v2943_v54, %v1683_v30  ;;  %v1921_v27 = vmul.f32 %v2949_v32, %v4696_v49  ;;  %vm1447_vm7 = vmor %vm1445_vm14, %vm1446_vm4 }
 0x247   : > { %v1443_v63 = vmul.f32 %v2947_v11, %v1442_v51  ;;  %v2158_v40 = vsel %vm4701_vm11, %v2157_v47, %v2153_v37  ;;  %vm1925_vm6 = vweird.f32 %v4696_v49  ;;  %v1464_v14 = vand.u32 2147483647, %v4709_v13 }
 0x248   : > { %v1466_v35 = vand.u32 2147483648, %v4709_v13  ;;  %2266 = vst.msk [vmem:[%s3730_s19 + $0x1e0] sm:$0xff] %vm2205_vm0, %v2158_v40  ;;  %v1688_v41 = vsel %vm1687_vm5, %v2943_v54, %v1684_v28  ;;  %v1922_v20 = vsub.f32 1.0, %v1921_v27  ;;  %2952 = vrcp.f32 %v4743_v31 }
 0x249   : > { %v1444_v33 = vadd.f32 %v2947_v11, %v1443_v63  ;;  %v1693_v44 = vsel %vm4714_vm12, %v1692_v22, %v1688_v41  ;;  %vm4762_vm8 = vcmp.eq.f32.partialorder %v1929_v25, 8.507059e+37  ;;  %v1932_v3 = vor.u32 1.1754944e-38, %v1931_v36 }
 0x24a   : > { %v2951_v43 = vpop.eup %2950  ;;  %vm1460_vm9 = vweird.f32 %v4709_v13  ;;  %2235 = vst.msk [vmem:[%s3730_s19 + $0xe8] sm:$0xff] %vm2205_vm0, %v1693_v44  ;;  %v1923_v50 = vmul.f32 %v2949_v32, %v1922_v20  ;;  %vm1926_vm11 = vweird.f32 %v2949_v32  ;;  %vm4772_vm10 = vcmp.eq.f32.partialorder %v1464_v14, 8.507059e+37 }
 0x24b   : > { %v1448_v45 = vsel %vm1447_vm7, %v2947_v11, %v1444_v33  ;;  %v1456_v12 = vmul.f32 %v2951_v43, %v4709_v13  ;;  %v1467_v55 = vor.u32 1.1754944e-38, %v1466_v35  ;;  %2954 = vpow2.f32 %v4685_v39  ;;  %vm1927_vm12 = vmor %vm1925_vm6, %vm1926_vm11 }
 0x24c   : > { %v1453_v34 = vsel %vm4729_vm1, %v1452_v29, %v1448_v45  ;;  %v1924_v47 = vadd.f32 %v2949_v32, %v1923_v50  ;;  %v972_v56 = vadd.f32 %v3595_v38, %v4718_v2  ;;  %v956_v52 = vadd.f32 %v3595_v38, %v4720_v16 }
 0x24d   : > { %2219 = vst.msk [vmem:[%s3730_s19 + $0x68] sm:$0xff] %vm2205_vm0, %v1453_v34  ;;  %v1457_v57 = vsub.f32 1.0, %v1456_v12  ;;  %vm1461_vm13 = vweird.f32 %v2951_v43  ;;  %v940_v61 = vadd.f32 %v3595_v38, %v826_v26  ;;  %v987_v39 = vadd.f32 %v3595_v38, %v920_v59 }
 0x24e   : > { %v986_v58 = vadd.f32 %v3595_v38, %v918_v42  ;;  %v2953_v1 = vpop.eup %2952  ;;  %v1928_v4 = vsel %vm1927_vm12, %v2949_v32, %v1924_v47  ;;  %v2463_v54 = vmul.f32 -1.442695, %v972_v56  ;;  %v2447_v60 = vmul.f32 -1.442695, %v956_v52  ;;  %vm1462_vm14 = vmor %vm1460_vm9, %vm1461_vm13 }
 0x24f   : > { %v1458_v5 = vmul.f32 %v2951_v43, %v1457_v57  ;;  %v1933_v8 = vsel %vm4762_vm8, %v1932_v3, %v1928_v4  ;;  %v1936_v7 = vmul.f32 %v2953_v1, %v4743_v31  ;;  %v2431_v15 = vmul.f32 -1.442695, %v940_v61 }
 0x250   : > { %v988_v49 = vadd.f32 %v3595_v38, %v922_v53  ;;  %2251 = vst.msk [vmem:[%s3730_s19 + $0x168] sm:$0xff] %vm2205_vm0, %v1933_v8  ;;  %v1944_v10 = vand.u32 2147483647, %v4743_v31  ;;  %2956 = vpow2.f32 %v2463_v54  ;;  %v2478_v6 = vmul.f32 -1.442695, %v987_v39 }
 0x251   : > { %v1459_v0 = vadd.f32 %v2951_v43, %v1458_v5  ;;  %v2955_v2 = vpop.eup %2954  ;;  %v1937_v16 = vsub.f32 1.0, %v1936_v7  ;;  %v1946_v11 = vand.u32 2147483648, %v4743_v31  ;;  %2958 = vpow2.f32 %v2447_v60 }
 0x252   : > { %v2477_v19 = vmul.f32 -1.442695, %v986_v58  ;;  %vm1941_vm15 = vweird.f32 %v2953_v1  ;;  %v1211_v38 = vadd.f32 1.0, %v2955_v2  ;;  %2960 = vpow2.f32 %v2431_v15 }
 0x253   : > { %v1463_v22 = vsel %vm1462_vm14, %v2951_v43, %v1459_v0  ;;  %v1938_v18 = vmul.f32 %v2953_v1, %v1937_v16  ;;  %2962 = vpow2.f32 %v2478_v6  ;;  %v2479_v48 = vmul.f32 -1.442695, %v988_v49 }
 0x254   : > { %v1468_v23 = vsel %vm4772_vm10, %v1467_v55, %v1463_v22  ;;  %2964 = vrcp.f32 %v1211_v38  ;;  %vm1940_vm1 = vweird.f32 %v4743_v31  ;;  %v1947_v26 = vor.u32 1.1754944e-38, %v1946_v11 }
 0x255   : > { %2220 = vst.msk [vmem:[%s3730_s19 + $0x70] sm:$0xff] %vm2205_vm0, %v1468_v23  ;;  %v1939_v13 = vadd.f32 %v2953_v1, %v1938_v18  ;;  %2966 = vpow2.f32 %v2477_v19  ;;  %vm1942_vm2 = vmor %vm1940_vm1, %vm1941_vm15  ;;  %vm1945_vm3 = vcmp.eq.f32.partialorder %v1944_v10, 8.507059e+37  ;;  %v1704_v25 = vand.u32 2147483647, %v1211_v38 }
 0x256   : > { %v2957_v9 = vpop.eup %2956  ;;  %2968 = vpow2.f32 %v2479_v48  ;;  %v1706_v28 = vand.u32 2147483648, %v1211_v38  ;;  %vm1700_vm4 = vweird.f32 %v1211_v38 }
 0x257   : > { %v2959_v17 = vpop.eup %2958  ;;  %v1943_v29 = vsel %vm1942_vm2, %v2953_v1, %v1939_v13  ;;  %v4804_v24 = vadd.f32 1.0, %v2957_v9  ;;  %vm4816_vm5 = vcmp.eq.f32.partialorder %v1704_v25, 8.507059e+37 }
 0x258   : > { %v2961_v62 = vpop.eup %2960  ;;  %v1948_v30 = vsel %vm1945_vm3, %v1947_v26, %v1943_v29  ;;  %v4806_v51 = vadd.f32 1.0, %v2959_v17  ;;  %v1707_v45 = vor.u32 1.1754944e-38, %v1706_v28 }
 0x259   : > { %v2963_v32 = vpop.eup %2962  ;;  %2252 = vst.msk [vmem:[%s3730_s19 + $0x170] sm:$0xff] %vm2205_vm0, %v1948_v30  ;;  %2970 = vrcp.f32 %v4804_v24  ;;  %v4812_v63 = vadd.f32 1.0, %v2961_v62  ;;  %v1959_v41 = vand.u32 2147483647, %v4804_v24  ;;  %v1961_v33 = vand.u32 2147483648, %v4804_v24 }
 0x25a   : > { %v2965_v36 = vpop.eup %2964  ;;  %2972 = vrcp.f32 %v4806_v51  ;;  %v4814_v27 = vadd.f32 1.0, %v2963_v32  ;;  %v1719_v20 = vand.u32 2147483647, %v4806_v51  ;;  %v1721_v43 = vand.u32 2147483648, %v4806_v51 }
 0x25b   : > { %v2967_v31 = vpop.eup %2966  ;;  %v1696_v37 = vmul.f32 %v2965_v36, %v1211_v38  ;;  %2974 = vrcp.f32 %v4812_v63  ;;  %vm1701_vm6 = vweird.f32 %v2965_v36  ;;  %vm1955_vm7 = vweird.f32 %v4804_v24 }
 0x25c   : > { %v2969_v40 = vpop.eup %2968  ;;  %v4825_v44 = vadd.f32 1.0, %v2967_v31  ;;  %2976 = vrcp.f32 %v4814_v27  ;;  %vm1715_vm8 = vweird.f32 %v4806_v51  ;;  %vm4833_vm9 = vcmp.eq.f32.partialorder %v1959_v41, 8.507059e+37  ;;  %vm1702_vm11 = vmor %vm1700_vm4, %vm1701_vm6 }
 0x25d   : > { %v1697_v14 = vsub.f32 1.0, %v1696_v37  ;;  %v4831_v59 = vadd.f32 1.0, %v2969_v40  ;;  %v1962_v46 = vor.u32 1.1754944e-38, %v1961_v33  ;;  %vm4839_vm10 = vcmp.eq.f32.partialorder %v1719_v20, 8.507059e+37 }
 0x25e   : > { %v1722_v56 = vor.u32 1.1754944e-38, %v1721_v43  ;;  %2978 = vrcp.f32 %v4825_v44  ;;  %v1479_v61 = vand.u32 2147483647, %v4812_v63  ;;  %v1481_v39 = vand.u32 2147483648, %v4812_v63 }
 0x25f   : > { %v2971_v21 = vpop.eup %2970  ;;  %v1698_v3 = vmul.f32 %v2965_v36, %v1697_v14  ;;  %2980 = vrcp.f32 %v4831_v59  ;;  %vm1475_vm14 = vweird.f32 %v4812_v63  ;;  %vm2180_vm15 = vweird.f32 %v4814_v27 }
 0x260   : > { %v2973_v50 = vpop.eup %2972  ;;  %v1951_v12 = vmul.f32 %v2971_v21, %v4804_v24  ;;  %vm1956_vm12 = vweird.f32 %v2971_v21  ;;  %v2184_v15 = vand.u32 2147483647, %v4814_v27  ;;  %vm4858_vm2 = vcmp.eq.f32.partialorder %v1479_v61, 8.507059e+37 }
 0x261   : > { %v1699_v42 = vadd.f32 %v2965_v36, %v1698_v3  ;;  %v1711_v55 = vmul.f32 %v2973_v50, %v4806_v51  ;;  %v2975_v58 = vpop.eup %2974  ;;  %vm1716_vm13 = vweird.f32 %v2973_v50  ;;  %vm1957_vm1 = vmor %vm1955_vm7, %vm1956_vm12  ;;  %v1482_v6 = vor.u32 1.1754944e-38, %v1481_v39 }
 0x262   : > { %v1952_v47 = vsub.f32 1.0, %v1951_v12  ;;  %v2977_v5 = vpop.eup %2976  ;;  %v1471_v60 = vmul.f32 %v2975_v58, %v4812_v63  ;;  %vm1717_vm3 = vmor %vm1715_vm8, %vm1716_vm13  ;;  %vm1476_vm4 = vweird.f32 %v2975_v58  ;;  %v2186_v19 = vand.u32 2147483648, %v4814_v27 }
 0x263   : > { %v1703_v52 = vsel %vm1702_vm11, %v2965_v36, %v1699_v42  ;;  %v1712_v53 = vsub.f32 1.0, %v1711_v55  ;;  %v2176_v7 = vmul.f32 %v2977_v5, %v4814_v27  ;;  %vm4872_vm6 = vcmp.eq.f32.partialorder %v2184_v15, 8.507059e+37  ;;  %vm1477_vm8 = vmor %vm1475_vm14, %vm1476_vm4 }
 0x264   : > { %v1708_v1 = vsel %vm4816_vm5, %v1707_v45, %v1703_v52  ;;  %v1953_v4 = vmul.f32 %v2971_v21, %v1952_v47  ;;  %v1472_v0 = vsub.f32 1.0, %v1471_v60  ;;  %v2979_v2 = vpop.eup %2978  ;;  %vm2181_vm5 = vweird.f32 %v2977_v5 }
 0x265   : > { %2236 = vst.msk [vmem:[%s3730_s19 + $0xf0] sm:$0xff] %vm2205_vm0, %v1708_v1  ;;  %v1713_v54 = vmul.f32 %v2973_v50, %v1712_v53  ;;  %v2177_v11 = vsub.f32 1.0, %v2176_v7  ;;  %v2161_v18 = vmul.f32 %v2979_v2, %v4825_v44  ;;  %v2981_v48 = vpop.eup %2980  ;;  %vm2165_vm7 = vweird.f32 %v4825_v44 }
 0x266   : > { %v1954_v8 = vadd.f32 %v2971_v21, %v1953_v4  ;;  %v1473_v23 = vmul.f32 %v2975_v58, %v1472_v0  ;;  %v2191_v24 = vmul.f32 %v2981_v48, %v4831_v59  ;;  %v2187_v30 = vor.u32 1.1754944e-38, %v2186_v19 }
 0x267   : > { %v1714_v49 = vadd.f32 %v2973_v50, %v1713_v54  ;;  %v2178_v9 = vmul.f32 %v2977_v5, %v2177_v11  ;;  %v2162_v29 = vsub.f32 1.0, %v2161_v18  ;;  %v2169_v51 = vand.u32 2147483647, %v4825_v44 }
 0x268   : > { %v1958_v16 = vsel %vm1957_vm1, %v2971_v21, %v1954_v8  ;;  %v1474_v17 = vadd.f32 %v2975_v58, %v1473_v23  ;;  %v2171_v32 = vand.u32 2147483648, %v4825_v44  ;;  %vm2166_vm11 = vweird.f32 %v2979_v2 }
 0x269   : > { %v1963_v22 = vsel %vm4833_vm9, %v1962_v46, %v1958_v16  ;;  %v1718_v38 = vsel %vm1717_vm3, %v2973_v50, %v1714_v49  ;;  %v2179_v62 = vadd.f32 %v2977_v5, %v2178_v9  ;;  %vm2182_vm9 = vmor %vm2180_vm15, %vm2181_vm5  ;;  %v2163_v36 = vmul.f32 %v2979_v2, %v2162_v29 }
 0x26a   : > { %2253 = vst.msk [vmem:[%s3730_s19 + $0x178] sm:$0xff] %vm2205_vm0, %v1963_v22  ;;  %v1723_v13 = vsel %vm4839_vm10, %v1722_v56, %v1718_v38  ;;  %v1478_v25 = vsel %vm1477_vm8, %v2975_v58, %v1474_v17  ;;  %v2192_v31 = vsub.f32 1.0, %v2191_v24  ;;  %v2199_v63 = vand.u32 2147483647, %v4831_v59  ;;  %vm2167_vm12 = vmor %vm2165_vm7, %vm2166_vm11 }
 0x26b   : > { %2237 = vst.msk [vmem:[%s3730_s19 + $0xf8] sm:$0xff] %vm2205_vm0, %v1723_v13  ;;  %v1483_v37 = vsel %vm4858_vm2, %v1482_v6, %v1478_v25  ;;  %v2183_v28 = vsel %vm2182_vm9, %v2977_v5, %v2179_v62  ;;  %v2201_v40 = vand.u32 2147483648, %v4831_v59  ;;  %v2164_v35 = vadd.f32 %v2979_v2, %v2163_v36 }
 0x26c   : > { %2221 = vst.msk [vmem:[%s3730_s19 + $0x78] sm:$0xff] %vm2205_vm0, %v1483_v37  ;;  %v2188_v14 = vsel %vm4872_vm6, %v2187_v30, %v2183_v28  ;;  %v2193_v27 = vmul.f32 %v2981_v48, %v2192_v31  ;;  %vm2196_vm10 = vweird.f32 %v2981_v48  ;;  %v2172_v41 = vor.u32 1.1754944e-38, %v2171_v32 }
 0x26d   : > { %2268 = vst.msk [vmem:[%s3730_s19 + $0x1f0] sm:$0xff] %vm2205_vm0, %v2188_v14  ;;  %v2168_v33 = vsel %vm2167_vm12, %v2979_v2, %v2164_v35  ;;  %vm2170_vm13 = vcmp.eq.f32.partialorder %v2169_v51, 8.507059e+37  ;;  %vm2195_vm14 = vweird.f32 %v4831_v59  ;;  %v2202_v21 = vor.u32 1.1754944e-38, %v2201_v40 }
 0x26e   : > { %v2194_v20 = vadd.f32 %v2981_v48, %v2193_v27  ;;  %v2173_v43 = vsel %vm2170_vm13, %v2172_v41, %v2168_v33  ;;  %vm2197_vm15 = vmor %vm2195_vm14, %vm2196_vm10  ;;  %vm2200_vm1 = vcmp.eq.f32.partialorder %v2199_v63, 8.507059e+37 }
 0x26f   : > { %2267 = vst.msk [vmem:[%s3730_s19 + $0x1e8] sm:$0xff] %vm2205_vm0, %v2173_v43 }
 0x270   : > { %v2198_v3 = vsel %vm2197_vm15, %v2981_v48, %v2194_v20 }
 0x271   : > { %v2203_v45 = vsel %vm2200_vm1, %v2202_v21, %v2198_v3 }
 0x272   : > { %2269 = vst.msk [vmem:[%s3730_s19 + $0x1f8] sm:$0xff] %vm2205_vm0, %v2203_v45 }
 0x273 PF: > { %s2317_s18 = sand.u32 1, %s3102_s23   ;;  %p5041_p3 = scmp.ge.s32.totalorder %s3114_s26, 2 }
 0x274   : > { %s2318_s9 = scalar_lea.sflag [#allocation5], %s2317_s18 }
 0x275   : > { %p2552_p13 = pnand %p5041_p3, %p3194_p6 }
 0x277   : > { %p2553_p0 = pneg %p2552_p13 }
 0x279   : > { %3097 = dma.done.wait (%p2553_p0), %s2318_s9, 8192  }
 0x27a   : > { %3099 = vsyncadd (%p2553_p0), %s2318_s9, 4294959104  ;;  %p22_p5 = scmp.ge.s32.totalorder %s3212_s12, 4   ;;  %s5042_s23 = smov %s3106_s24 }
 0x27b   : > { %s5043_s24 = smov %s3110_s25  ;;  %s5044_s25 = smov %s3224_s17 }
 0x27c   : > { %s5045_s26 = smov %s3212_s12  ;;  %24 = sbr.rel (!%p22_p5) target bundleno = 8 (0x8), region = 101 }
 0x281   :  { %2324 = vsyncpa [#allocation4], 1 }
 0x282   :  { %2326 = vsyncpa [#allocation4 + $0x1], 1 }
 0x283   :  { %2327 = vsyncpa [#allocation7], 1 }
 0x284   :  { %2328 = vsyncpa [#allocation5], 1 }
 0x285   :  { %2330 = vsyncpa [#allocation5 + $0x1], 1 }

</bundles_post_ra>
